<compile_context>
chip_gen: v7x
topology: tpu7x:2x2x1
jax: 0.10.0
libtpu: 0.0.40
codegen_flags: <defaults>
</compile_context>

<pallas_src>
import math

import jax
import jax.numpy as jnp
from jax.experimental import pallas as pl
from jax.experimental.pallas import tpu as pltpu

# ----------------------------- model config (small) -----------------------------
VOCAB = 128
D_MODEL = 32
N_HEADS = 4
D_KV = 8                 # N_HEADS * D_KV == D_MODEL (inner dim)
D_FF = 64
N_LAYERS = 2
MAX_LEN = 8              # stands in for max_length=77
NUM_BUCKETS = 32
MAX_DISTANCE = 128
EPS = 1e-6


# ----------------------------- fused encoder kernel ------------------------------
def _t5_encoder_kernel(x0_ref, bias_ref, ln_attn_ref, wq_ref, wk_ref, wv_ref,
                       wo_ref, ln_ff_ref, wi_ref, wo_ff_ref, ln_final_ref,
                       out_ref):
    """Grid = (B,).  One grid step = one batch element, ALL layers.

    Weight refs (constant block index) are resident in VMEM across the whole grid.
    The residual stream is the fori_loop carry (SSA value, vregs only).
    """
    S, D = x0_ref.shape[1], x0_ref.shape[2]
    L, H, Dk, _ = wq_ref.shape
    F = wo_ff_ref.shape[1]
    c_gelu = math.sqrt(2.0 / math.pi)

    def rms(v, w):  # T5 LayerNorm: no mean subtraction, no bias; f32 stats.
        var = jnp.mean(v * v, axis=-1, keepdims=True)
        return v * jax.lax.rsqrt(var + EPS) * w

    bias = bias_ref[...]                          # (H, S, S) -- loaded once, reused by all layers
    x = x0_ref[0].astype(jnp.float32)             # (S, D) residual stream (SSA carry)

    def layer(l, x):
        # =========================== self-attention block ===========================
        xn = rms(x, ln_attn_ref[l])                                     # (S, D)
        xn_b = jnp.broadcast_to(xn[None, :, :], (H, S, D))              # heads on leading axis
        # Per-head projections as batched matmuls against head-major weights (L,H,Dk,D):
        # no lane slicing of a fused QKV slab, no activation relayouts.
        q = jnp.einsum('hsd,hkd->hsk', xn_b, wq_ref[l],
                       preferred_element_type=jnp.float32)              # (H, S, Dk)
        k = jnp.einsum('hsd,hkd->hsk', xn_b, wk_ref[l],
                       preferred_element_type=jnp.float32)              # (H, S, Dk)
        v = jnp.einsum('hsd,hkd->hsk', xn_b, wv_ref[l],
                       preferred_element_type=jnp.float32)              # (H, S, Dk)

        # T5 does NOT scale scores by 1/sqrt(d); add relative-position bias.
        s = jnp.einsum('hsk,htk->hst', q, k,
                       preferred_element_type=jnp.float32) + bias       # (H, S, S)
        s = s - jnp.max(s, axis=-1, keepdims=True)
        p = jnp.exp(s)
        p = p * pl.reciprocal(jnp.sum(p, axis=-1, keepdims=True), approx=True)
        o = jnp.einsum('hst,htk->hsk', p, v,
                       preferred_element_type=jnp.float32)              # (H, S, Dk)

        # Output projection with head-major Wo (L,H,Dk,D); concat-of-heads @ Wo is
        # equivalent to a per-head matmul followed by a (cheap) leading-axis sum.
        att = jnp.einsum('hsk,hkd->hsd', o, wo_ref[l],
                         preferred_element_type=jnp.float32)            # (H, S, D)
        x = x + jnp.sum(att, axis=0)                                    # residual add

        # =========================== gated-GELU FFN block ===========================
        xn = rms(x, ln_ff_ref[l])                                       # (S, D)
        # Fused Wi0|Wi1: one MXU pass, N = 2*F = 128 (fully lane-dense).
        hh = jnp.dot(xn, wi_ref[l], preferred_element_type=jnp.float32)  # (S, 2F)
        h0 = hh[:, :F]                                                   # gate
        h1 = hh[:, F:]                                                   # linear
        g = 0.5 * h0 * (1.0 + jnp.tanh(c_gelu * (h0 + 0.044715 * (h0 * h0 * h0)))) * h1
        x = x + jnp.dot(g, wo_ff_ref[l], preferred_element_type=jnp.float32)
        return x

    x = jax.lax.fori_loop(0, L, layer, x, unroll=True)

    # =========================== final RMSNorm + store ==========================
    out_ref[0] = rms(x, ln_final_ref[...]).astype(out_ref.dtype)


def pallas_t5_encoder(x0, bias, kp):
    """x0: (B,S,D) embedded tokens; bias: (H,S,S) rel-pos bias -> (B,S,D) f32."""
    B, S, D = x0.shape

    def const(nd):            # resident blocks: same block index for every grid step
        return lambda b: (0,) * nd

    per_b = lambda b: (b, 0, 0)

    return pl.pallas_call(
        _t5_encoder_kernel,
        out_shape=jax.ShapeDtypeStruct((B, S, D), jnp.float32),
        grid=(B,),
        in_specs=[
            pl.BlockSpec((1, S, D), per_b),                    # x0 (embedded tokens)
            pl.BlockSpec(bias.shape, const(3)),                # rel-pos bias (resident)
            pl.BlockSpec(kp["ln_attn"].shape, const(3)),       # (L,1,D)
            pl.BlockSpec(kp["wq"].shape, const(4)),            # (L,H,Dk,D) head-major Wq^T
            pl.BlockSpec(kp["wk"].shape, const(4)),            # (L,H,Dk,D)
            pl.BlockSpec(kp["wv"].shape, const(4)),            # (L,H,Dk,D)
            pl.BlockSpec(kp["wo"].shape, const(4)),            # (L,H,Dk,D) head-major Wo
            pl.BlockSpec(kp["ln_ff"].shape, const(3)),         # (L,1,D)
            pl.BlockSpec(kp["wi"].shape, const(3)),            # (L,D,2F) fused Wi0|Wi1
            pl.BlockSpec(kp["wo_ff"].shape, const(3)),         # (L,F,D)
            pl.BlockSpec(kp["ln_final"].shape, const(2)),      # (1,D)
        ],
        out_specs=pl.BlockSpec((1, S, D), per_b),
        compiler_params=pltpu.CompilerParams(
            dimension_semantics=("parallel",)),                # batch across TCs on v7x
    )(x0, bias, kp["ln_attn"], kp["wq"], kp["wk"], kp["wv"], kp["wo"],
      kp["ln_ff"], kp["wi"], kp["wo_ff"], kp["ln_final"])


# ----------------------------- glue (plain JAX, jitted with the kernel) -----------
def t5_relative_position_bucket(rel_pos, num_buckets=NUM_BUCKETS, max_distance=MAX_DISTANCE):
    # Bidirectional bucketing, matches HF T5Attention._relative_position_bucket.
    num_buckets //= 2
    ret = (rel_pos > 0).astype(jnp.int32) * num_buckets
    n = jnp.abs(rel_pos)
    max_exact = num_buckets // 2
    is_small = n < max_exact
    n_f = jnp.maximum(n.astype(jnp.float32), 1.0)  # guard log(0); masked by is_small anyway
    val_large = max_exact + (
        jnp.log(n_f / max_exact) / math.log(max_distance / max_exact) * (num_buckets - max_exact)
    ).astype(jnp.int32)
    val_large = jnp.minimum(val_large, num_buckets - 1)
    return ret + jnp.where(is_small, n, val_large)


def compute_position_bias(rel_bias_table, seq_len):
    ctx = jnp.arange(seq_len)[:, None]
    mem = jnp.arange(seq_len)[None, :]
    buckets = t5_relative_position_bucket(mem - ctx)             # (S, S)
    vals = rel_bias_table[buckets]                               # (S, S, H)
    return jnp.transpose(vals, (2, 0, 1)).astype(jnp.float32)    # (H, S, S)


@jax.jit
def t5_encoder_forward(kparams, tokens):
    """tokens: (B, S) int32 -> last_hidden_state (B, S, D_MODEL) float32."""
    # TODO(synk): embedding gather could be fused in-kernel (resident embed table + scalar
    # prefetch of tokens); kept in the jitted wrapper -- negligible at (2, 8, 32).
    x0 = jnp.take(kparams["embed"], tokens, axis=0).astype(jnp.float32)  # (B, S, D)
    bias = compute_position_bias(kparams["rel_bias"], tokens.shape[1])   # (H, S, S)
    return pallas_t5_encoder(x0, bias, kparams)


# ----------------------------- params (synthetic) + kernel packing ----------------
def init_params(key):
    """Natural (HF-like) weight shapes; used directly by the pure-JAX reference."""
    def nrm(k, shape, scale=0.02):
        return (scale * jax.random.normal(k, shape)).astype(jnp.float32)

    keys = jax.random.split(key, 2 + N_LAYERS)
    inner = N_HEADS * D_KV
    wq, wk, wv, wo, wi0, wi1, wo_ff = [], [], [], [], [], [], []
    for l in range(N_LAYERS):
        lk = jax.random.split(keys[2 + l], 7)
        wq.append(nrm(lk[0], (D_MODEL, inner)))
        wk.append(nrm(lk[1], (D_MODEL, inner)))
        wv.append(nrm(lk[2], (D_MODEL, inner)))
        wo.append(nrm(lk[3], (inner, D_MODEL)))
        wi0.append(nrm(lk[4], (D_MODEL, D_FF)))
        wi1.append(nrm(lk[5], (D_MODEL, D_FF)))
        wo_ff.append(nrm(lk[6], (D_FF, D_MODEL)))
    return {
        "embed": nrm(keys[0], (VOCAB, D_MODEL), 1.0),
        "rel_bias": nrm(keys[1], (NUM_BUCKETS, N_HEADS)),
        "ln_attn": jnp.ones((N_LAYERS, D_MODEL), jnp.float32),
        "wq": jnp.stack(wq), "wk": jnp.stack(wk), "wv": jnp.stack(wv),
        "wo": jnp.stack(wo),
        "ln_ff": jnp.ones((N_LAYERS, D_MODEL), jnp.float32),
        "wi0": jnp.stack(wi0), "wi1": jnp.stack(wi1),
        "wo_ff": jnp.stack(wo_ff),
        "ln_final": jnp.ones((D_MODEL,), jnp.float32),
    }


def pack_params(p):
    """Host-side repack into kernel layouts (heads on a leading axis; fused Wi0|Wi1)."""
    L, D, inner = p["wq"].shape
    H, Dk = N_HEADS, D_KV
    # (L, D, H*Dk) -> (L, H, Dk, D):  w_h[l, h, k, d] = W[l][d, h*Dk + k]
    head_major_T = lambda w: w.reshape(L, D, H, Dk).transpose(0, 2, 3, 1)
    return {
        "embed": p["embed"],
        "rel_bias": p["rel_bias"],
        "ln_attn": p["ln_attn"][:, None, :],                       # (L, 1, D)
        "wq": head_major_T(p["wq"]),                               # (L, H, Dk, D)
        "wk": head_major_T(p["wk"]),
        "wv": head_major_T(p["wv"]),
        "wo": p["wo"].reshape(L, H, Dk, D),                        # (L, H, Dk, D)
        "ln_ff": p["ln_ff"][:, None, :],                           # (L, 1, D)
        "wi": jnp.concatenate([p["wi0"], p["wi1"]], axis=-1),      # (L, D, 2F)
        "wo_ff": p["wo_ff"],                                       # (L, F, D)
        "ln_final": p["ln_final"][None, :],                        # (1, D)
    }


# ----------------------------- pure-JAX reference ---------------------------------
def t5_encoder_reference(p, tokens):
    x = jnp.take(p["embed"], tokens, axis=0).astype(jnp.float32)
    B, S, D = x.shape
    bias = compute_position_bias(p["rel_bias"], S)
    L = p["wq"].shape[0]
    H = bias.shape[0]
    inner = p["wq"].shape[2]
    dk = inner // H

    def rms(v, w):
        var = jnp.mean(v * v, axis=-1, keepdims=True)
        return v * jax.lax.rsqrt(var + EPS) * w

    for l in range(L):
        xn = rms(x, p["ln_attn"][l])
        q = (xn @ p["wq"][l]).reshape(B, S, H, dk).transpose(0, 2, 1, 3)
        k = (xn @ p["wk"][l]).reshape(B, S, H, dk).transpose(0, 2, 1, 3)
        v = (xn @ p["wv"][l]).reshape(B, S, H, dk).transpose(0, 2, 1, 3)
        s = jnp.einsum('bhqd,bhkd->bhqk', q, k) + bias[None]
        pr = jax.nn.softmax(s, axis=-1)
        o = jnp.einsum('bhqk,bhkd->bhqd', pr, v).transpose(0, 2, 1, 3).reshape(B, S, inner)
        x = x + o @ p["wo"][l]
        xn = rms(x, p["ln_ff"][l])
        h0 = xn @ p["wi0"][l]
        h1 = xn @ p["wi1"][l]
        c = math.sqrt(2.0 / math.pi)
        g = 0.5 * h0 * (1.0 + jnp.tanh(c * (h0 + 0.044715 * h0 ** 3))) * h1
        x = x + g @ p["wo_ff"][l]
    return rms(x, p["ln_final"])


# ----------------------------- driver ----------------------------------------------
if __name__ == "__main__":
    key = jax.random.PRNGKey(0)
    pkey, tkey = jax.random.split(key)
    nparams = init_params(pkey)
    kparams = pack_params(nparams)

    # "tokenized" input: batch of 2 padded sequences of length MAX_LEN
    tokens = jax.random.randint(tkey, (2, MAX_LEN), 0, VOCAB, dtype=jnp.int32)

    z = jax.block_until_ready(t5_encoder_forward(kparams, tokens))

    assert z.shape == (2, MAX_LEN, D_MODEL) and z.dtype == jnp.float32
    assert bool(jnp.all(jnp.isfinite(z)))

    # Tolerance check vs. pure-JAX reference (approx reciprocal in softmax -> ~1e-3 rel dev).
    z_ref = jax.block_until_ready(t5_encoder_reference(nparams, tokens))
    max_err = float(jnp.max(jnp.abs(z - z_ref)))
    assert max_err < 5e-2, f"mismatch vs reference: {max_err}"

    print("KERNEL_OK")
</pallas_src>

<mosaic_0001>
module attributes {stable_mosaic.version = 11 : i64} {
  func.func @_t5_encoder_kernel(%arg0: i32, %arg1: memref<1x8x32xf32, #tpu.memory_space<vmem>>, %arg2: memref<4x8x8xf32, #tpu.memory_space<vmem>>, %arg3: memref<2x1x32xf32, #tpu.memory_space<vmem>>, %arg4: memref<2x4x8x32xf32, #tpu.memory_space<vmem>>, %arg5: memref<2x4x8x32xf32, #tpu.memory_space<vmem>>, %arg6: memref<2x4x8x32xf32, #tpu.memory_space<vmem>>, %arg7: memref<2x4x8x32xf32, #tpu.memory_space<vmem>>, %arg8: memref<2x1x32xf32, #tpu.memory_space<vmem>>, %arg9: memref<2x32x128xf32, #tpu.memory_space<vmem>>, %arg10: memref<2x64x32xf32, #tpu.memory_space<vmem>>, %arg11: memref<1x32xf32, #tpu.memory_space<vmem>>, %arg12: memref<1x8x32xf32, #tpu.memory_space<vmem>>) attributes {dimension_semantics = [#tpu.dimension_semantics<parallel>], iteration_bounds = array<i64: 2>, scalar_prefetch = 0 : i64, scratch_operands = 0 : i64, tpu.core_type = #tpu.core_type<tc>, window_params = [{transform_indices = @transform_0, window_bounds = array<i64: 1, 8, 32>}, {pipeline_mode = #tpu.pipeline_mode<synchronous>, transform_indices = @transform_1, window_bounds = array<i64: 4, 8, 8>}, {pipeline_mode = #tpu.pipeline_mode<synchronous>, transform_indices = @transform_2, window_bounds = array<i64: 2, 1, 32>}, {pipeline_mode = #tpu.pipeline_mode<synchronous>, transform_indices = @transform_3, window_bounds = array<i64: 2, 4, 8, 32>}, {pipeline_mode = #tpu.pipeline_mode<synchronous>, transform_indices = @transform_4, window_bounds = array<i64: 2, 4, 8, 32>}, {pipeline_mode = #tpu.pipeline_mode<synchronous>, transform_indices = @transform_5, window_bounds = array<i64: 2, 4, 8, 32>}, {pipeline_mode = #tpu.pipeline_mode<synchronous>, transform_indices = @transform_6, window_bounds = array<i64: 2, 4, 8, 32>}, {pipeline_mode = #tpu.pipeline_mode<synchronous>, transform_indices = @transform_7, window_bounds = array<i64: 2, 1, 32>}, {pipeline_mode = #tpu.pipeline_mode<synchronous>, transform_indices = @transform_8, window_bounds = array<i64: 2, 32, 128>}, {pipeline_mode = #tpu.pipeline_mode<synchronous>, transform_indices = @transform_9, window_bounds = array<i64: 2, 64, 32>}, {pipeline_mode = #tpu.pipeline_mode<synchronous>, transform_indices = @transform_10, window_bounds = array<i64: 1, 32>}, {transform_indices = @transform_11, window_bounds = array<i64: 1, 8, 32>}]} {
    %c0 = arith.constant 0 : index
    %c0_0 = arith.constant 0 : index
    %c0_1 = arith.constant 0 : index
    %0 = vector.load %arg2[%c0, %c0_0, %c0_1] : memref<4x8x8xf32, #tpu.memory_space<vmem>>, vector<4x8x8xf32>
    %c0_2 = arith.constant 0 : index
    %c0_3 = arith.constant 0 : index
    %c0_4 = arith.constant 0 : index
    %1 = vector.load %arg1[%c0_2, %c0_3, %c0_4] : memref<1x8x32xf32, #tpu.memory_space<vmem>>, vector<1x8x32xf32>
    %2 = vector.shape_cast %1 : vector<1x8x32xf32> to vector<8x32xf32>
    %c0_i32 = arith.constant 0 : i32
    %3 = arith.index_cast %c0_i32 : i32 to index
    %c0_5 = arith.constant 0 : index
    %c0_6 = arith.constant 0 : index
    %4 = vector.load %arg3[%3, %c0_5, %c0_6] : memref<2x1x32xf32, #tpu.memory_space<vmem>>, vector<1x1x32xf32>
    %5 = vector.shape_cast %4 : vector<1x1x32xf32> to vector<1x32xf32>
    %6 = arith.mulf %2, %2 : vector<8x32xf32>
    %cst = arith.constant dense<0.000000e+00> : vector<8xf32>
    %7 = vector.multi_reduction <add>, %6, %cst [1] : vector<8x32xf32> to vector<8xf32>
    %8 = vector.shape_cast %7 : vector<8xf32> to vector<8x1xf32>
    %cst_7 = arith.constant 3.200000e+01 : f32
    %9 = vector.broadcast %cst_7 : f32 to vector<8x1xf32>
    %10 = arith.divf %8, %9 : vector<8x1xf32>
    %cst_8 = arith.constant 9.99999997E-7 : f32
    %11 = vector.broadcast %cst_8 : f32 to vector<8x1xf32>
    %12 = arith.addf %10, %11 : vector<8x1xf32>
    %13 = math.rsqrt %12 : vector<8x1xf32>
    %14 = vector.broadcast %13 : vector<8x1xf32> to vector<8x32xf32>
    %15 = arith.mulf %2, %14 : vector<8x32xf32>
    %16 = vector.broadcast %5 : vector<1x32xf32> to vector<8x32xf32>
    %17 = arith.mulf %15, %16 : vector<8x32xf32>
    %18 = vector.shape_cast %17 : vector<8x32xf32> to vector<1x8x32xf32>
    %19 = vector.shape_cast %18 : vector<1x8x32xf32> to vector<1x8x32xf32>
    %20 = vector.broadcast %19 : vector<1x8x32xf32> to vector<4x8x32xf32>
    %21 = arith.index_cast %c0_i32 : i32 to index
    %c0_9 = arith.constant 0 : index
    %c0_10 = arith.constant 0 : index
    %c0_11 = arith.constant 0 : index
    %22 = vector.load %arg4[%21, %c0_9, %c0_10, %c0_11] : memref<2x4x8x32xf32, #tpu.memory_space<vmem>>, vector<1x4x8x32xf32>
    %23 = vector.shape_cast %22 : vector<1x4x8x32xf32> to vector<4x8x32xf32>
    "tpu.trace_start"() <{level = 10 : i32, message = "hsd,hkd->hsk"}> : () -> ()
    %cst_12 = arith.constant dense<0.000000e+00> : vector<4x8x8xf32>
    %24 = tpu.matmul %20, %23, %cst_12 {dimension_numbers = #tpu.dot_dimension_numbers<[2], [2], [1], [1], [0, 0, 0, 1, 1, 1], [0], [0]>} : vector<4x8x32xf32>, vector<4x8x32xf32>, vector<4x8x8xf32> -> vector<4x8x8xf32>
    "tpu.trace_stop"() : () -> ()
    %25 = arith.index_cast %c0_i32 : i32 to index
    %c0_13 = arith.constant 0 : index
    %c0_14 = arith.constant 0 : index
    %c0_15 = arith.constant 0 : index
    %26 = vector.load %arg5[%25, %c0_13, %c0_14, %c0_15] : memref<2x4x8x32xf32, #tpu.memory_space<vmem>>, vector<1x4x8x32xf32>
    %27 = vector.shape_cast %26 : vector<1x4x8x32xf32> to vector<4x8x32xf32>
    "tpu.trace_start"() <{level = 10 : i32, message = "hsd,hkd->hsk"}> : () -> ()
    %cst_16 = arith.constant dense<0.000000e+00> : vector<4x8x8xf32>
    %28 = tpu.matmul %20, %27, %cst_16 {dimension_numbers = #tpu.dot_dimension_numbers<[2], [2], [1], [1], [0, 0, 0, 1, 1, 1], [0], [0]>} : vector<4x8x32xf32>, vector<4x8x32xf32>, vector<4x8x8xf32> -> vector<4x8x8xf32>
    "tpu.trace_stop"() : () -> ()
    %29 = arith.index_cast %c0_i32 : i32 to index
    %c0_17 = arith.constant 0 : index
    %c0_18 = arith.constant 0 : index
    %c0_19 = arith.constant 0 : index
    %30 = vector.load %arg6[%29, %c0_17, %c0_18, %c0_19] : memref<2x4x8x32xf32, #tpu.memory_space<vmem>>, vector<1x4x8x32xf32>
    %31 = vector.shape_cast %30 : vector<1x4x8x32xf32> to vector<4x8x32xf32>
    "tpu.trace_start"() <{level = 10 : i32, message = "hsd,hkd->hsk"}> : () -> ()
    %cst_20 = arith.constant dense<0.000000e+00> : vector<4x8x8xf32>
    %32 = tpu.matmul %20, %31, %cst_20 {dimension_numbers = #tpu.dot_dimension_numbers<[2], [2], [1], [1], [0, 0, 0, 1, 1, 1], [0], [0]>} : vector<4x8x32xf32>, vector<4x8x32xf32>, vector<4x8x8xf32> -> vector<4x8x8xf32>
    "tpu.trace_stop"() : () -> ()
    "tpu.trace_start"() <{level = 10 : i32, message = "hsk,htk->hst"}> : () -> ()
    %cst_21 = arith.constant dense<0.000000e+00> : vector<4x8x8xf32>
    %33 = tpu.matmul %24, %28, %cst_21 {dimension_numbers = #tpu.dot_dimension_numbers<[2], [2], [1], [1], [0, 0, 0, 1, 1, 1], [0], [0]>} : vector<4x8x8xf32>, vector<4x8x8xf32>, vector<4x8x8xf32> -> vector<4x8x8xf32>
    "tpu.trace_stop"() : () -> ()
    %34 = arith.addf %33, %0 : vector<4x8x8xf32>
    %cst_22 = arith.constant dense<0xFF800000> : vector<4x8xf32>
    %35 = vector.multi_reduction <maximumf>, %34, %cst_22 [2] : vector<4x8x8xf32> to vector<4x8xf32>
    %36 = vector.shape_cast %35 : vector<4x8xf32> to vector<4x8x1xf32>
    %37 = vector.broadcast %36 : vector<4x8x1xf32> to vector<4x8x8xf32>
    %38 = arith.subf %34, %37 : vector<4x8x8xf32>
    %39 = math.exp %38 : vector<4x8x8xf32>
    %cst_23 = arith.constant dense<0.000000e+00> : vector<4x8xf32>
    %40 = vector.multi_reduction <add>, %39, %cst_23 [2] : vector<4x8x8xf32> to vector<4x8xf32>
    %41 = vector.shape_cast %40 : vector<4x8xf32> to vector<4x8x1xf32>
    %42 = tpu.reciprocal %41 {approx = true} : vector<4x8x1xf32> -> vector<4x8x1xf32>
    %43 = vector.broadcast %42 : vector<4x8x1xf32> to vector<4x8x8xf32>
    %44 = arith.mulf %39, %43 : vector<4x8x8xf32>
    "tpu.trace_start"() <{level = 10 : i32, message = "hst,htk->hsk"}> : () -> ()
    %cst_24 = arith.constant dense<0.000000e+00> : vector<4x8x8xf32>
    %45 = tpu.matmul %44, %32, %cst_24 {dimension_numbers = #tpu.dot_dimension_numbers<[2], [1], [1], [2], [0, 0, 0, 1, 1, 2], [0], [0]>} : vector<4x8x8xf32>, vector<4x8x8xf32>, vector<4x8x8xf32> -> vector<4x8x8xf32>
    "tpu.trace_stop"() : () -> ()
    %46 = arith.index_cast %c0_i32 : i32 to index
    %c0_25 = arith.constant 0 : index
    %c0_26 = arith.constant 0 : index
    %c0_27 = arith.constant 0 : index
    %47 = vector.load %arg7[%46, %c0_25, %c0_26, %c0_27] : memref<2x4x8x32xf32, #tpu.memory_space<vmem>>, vector<1x4x8x32xf32>
    %48 = vector.shape_cast %47 : vector<1x4x8x32xf32> to vector<4x8x32xf32>
    "tpu.trace_start"() <{level = 10 : i32, message = "hsk,hkd->hsd"}> : () -> ()
    %cst_28 = arith.constant dense<0.000000e+00> : vector<4x8x32xf32>
    %49 = tpu.matmul %45, %48, %cst_28 {dimension_numbers = #tpu.dot_dimension_numbers<[2], [1], [1], [2], [0, 0, 0, 1, 1, 2], [0], [0]>} : vector<4x8x8xf32>, vector<4x8x32xf32>, vector<4x8x32xf32> -> vector<4x8x32xf32>
    "tpu.trace_stop"() : () -> ()
    %cst_29 = arith.constant dense<0.000000e+00> : vector<8x32xf32>
    %50 = vector.multi_reduction <add>, %49, %cst_29 [0] : vector<4x8x32xf32> to vector<8x32xf32>
    %51 = arith.addf %2, %50 : vector<8x32xf32>
    %52 = arith.index_cast %c0_i32 : i32 to index
    %c0_30 = arith.constant 0 : index
    %c0_31 = arith.constant 0 : index
    %53 = vector.load %arg8[%52, %c0_30, %c0_31] : memref<2x1x32xf32, #tpu.memory_space<vmem>>, vector<1x1x32xf32>
    %54 = vector.shape_cast %53 : vector<1x1x32xf32> to vector<1x32xf32>
    %55 = arith.mulf %51, %51 : vector<8x32xf32>
    %cst_32 = arith.constant dense<0.000000e+00> : vector<8xf32>
    %56 = vector.multi_reduction <add>, %55, %cst_32 [1] : vector<8x32xf32> to vector<8xf32>
    %57 = vector.shape_cast %56 : vector<8xf32> to vector<8x1xf32>
    %cst_33 = arith.constant 3.200000e+01 : f32
    %58 = vector.broadcast %cst_33 : f32 to vector<8x1xf32>
    %59 = arith.divf %57, %58 : vector<8x1xf32>
    %cst_34 = arith.constant 9.99999997E-7 : f32
    %60 = vector.broadcast %cst_34 : f32 to vector<8x1xf32>
    %61 = arith.addf %59, %60 : vector<8x1xf32>
    %62 = math.rsqrt %61 : vector<8x1xf32>
    %63 = vector.broadcast %62 : vector<8x1xf32> to vector<8x32xf32>
    %64 = arith.mulf %51, %63 : vector<8x32xf32>
    %65 = vector.broadcast %54 : vector<1x32xf32> to vector<8x32xf32>
    %66 = arith.mulf %64, %65 : vector<8x32xf32>
    %67 = arith.index_cast %c0_i32 : i32 to index
    %c0_35 = arith.constant 0 : index
    %c0_36 = arith.constant 0 : index
    %68 = vector.load %arg9[%67, %c0_35, %c0_36] : memref<2x32x128xf32, #tpu.memory_space<vmem>>, vector<1x32x128xf32>
    %69 = vector.shape_cast %68 : vector<1x32x128xf32> to vector<32x128xf32>
    %cst_37 = arith.constant dense<0.000000e+00> : vector<8x128xf32>
    %70 = tpu.matmul %66, %69, %cst_37 {dimension_numbers = #tpu.dot_dimension_numbers<[1], [0], [0], [1], [0, 0, 1, 1], [], []>} : vector<8x32xf32>, vector<32x128xf32>, vector<8x128xf32> -> vector<8x128xf32>
    %71 = vector.extract_strided_slice %70 {offsets = [0, 0], sizes = [8, 64], strides = [1, 1]} : vector<8x128xf32> to vector<8x64xf32>
    %72 = vector.extract_strided_slice %70 {offsets = [0, 64], sizes = [8, 64], strides = [1, 1]} : vector<8x128xf32> to vector<8x64xf32>
    %cst_38 = arith.constant 5.000000e-01 : f32
    %73 = vector.broadcast %cst_38 : f32 to vector<8x64xf32>
    %74 = arith.mulf %73, %71 : vector<8x64xf32>
    %75 = arith.mulf %71, %71 : vector<8x64xf32>
    %76 = arith.mulf %75, %71 : vector<8x64xf32>
    %cst_39 = arith.constant 4.471500e-02 : f32
    %77 = vector.broadcast %cst_39 : f32 to vector<8x64xf32>
    %78 = arith.mulf %77, %76 : vector<8x64xf32>
    %79 = arith.addf %71, %78 : vector<8x64xf32>
    %cst_40 = arith.constant 0.797884583 : f32
    %80 = vector.broadcast %cst_40 : f32 to vector<8x64xf32>
    %81 = arith.mulf %80, %79 : vector<8x64xf32>
    %82 = math.tanh %81 : vector<8x64xf32>
    %cst_41 = arith.constant 1.000000e+00 : f32
    %83 = vector.broadcast %cst_41 : f32 to vector<8x64xf32>
    %84 = arith.addf %83, %82 : vector<8x64xf32>
    %85 = arith.mulf %74, %84 : vector<8x64xf32>
    %86 = arith.mulf %85, %72 : vector<8x64xf32>
    %87 = arith.index_cast %c0_i32 : i32 to index
    %c0_42 = arith.constant 0 : index
    %c0_43 = arith.constant 0 : index
    %88 = vector.load %arg10[%87, %c0_42, %c0_43] : memref<2x64x32xf32, #tpu.memory_space<vmem>>, vector<1x64x32xf32>
    %89 = vector.shape_cast %88 : vector<1x64x32xf32> to vector<64x32xf32>
    %cst_44 = arith.constant dense<0.000000e+00> : vector<8x32xf32>
    %90 = tpu.matmul %86, %89, %cst_44 {dimension_numbers = #tpu.dot_dimension_numbers<[1], [0], [0], [1], [0, 0, 1, 1], [], []>} : vector<8x64xf32>, vector<64x32xf32>, vector<8x32xf32> -> vector<8x32xf32>
    %91 = arith.addf %51, %90 : vector<8x32xf32>
    %c1_i32 = arith.constant 1 : i32
    %92 = arith.index_cast %c1_i32 : i32 to index
    %c0_45 = arith.constant 0 : index
    %c0_46 = arith.constant 0 : index
    %93 = vector.load %arg3[%92, %c0_45, %c0_46] : memref<2x1x32xf32, #tpu.memory_space<vmem>>, vector<1x1x32xf32>
    %94 = vector.shape_cast %93 : vector<1x1x32xf32> to vector<1x32xf32>
    %95 = arith.mulf %91, %91 : vector<8x32xf32>
    %cst_47 = arith.constant dense<0.000000e+00> : vector<8xf32>
    %96 = vector.multi_reduction <add>, %95, %cst_47 [1] : vector<8x32xf32> to vector<8xf32>
    %97 = vector.shape_cast %96 : vector<8xf32> to vector<8x1xf32>
    %cst_48 = arith.constant 3.200000e+01 : f32
    %98 = vector.broadcast %cst_48 : f32 to vector<8x1xf32>
    %99 = arith.divf %97, %98 : vector<8x1xf32>
    %cst_49 = arith.constant 9.99999997E-7 : f32
    %100 = vector.broadcast %cst_49 : f32 to vector<8x1xf32>
    %101 = arith.addf %99, %100 : vector<8x1xf32>
    %102 = math.rsqrt %101 : vector<8x1xf32>
    %103 = vector.broadcast %102 : vector<8x1xf32> to vector<8x32xf32>
    %104 = arith.mulf %91, %103 : vector<8x32xf32>
    %105 = vector.broadcast %94 : vector<1x32xf32> to vector<8x32xf32>
    %106 = arith.mulf %104, %105 : vector<8x32xf32>
    %107 = vector.shape_cast %106 : vector<8x32xf32> to vector<1x8x32xf32>
    %108 = vector.shape_cast %107 : vector<1x8x32xf32> to vector<1x8x32xf32>
    %109 = vector.broadcast %108 : vector<1x8x32xf32> to vector<4x8x32xf32>
    %110 = arith.index_cast %c1_i32 : i32 to index
    %c0_50 = arith.constant 0 : index
    %c0_51 = arith.constant 0 : index
    %c0_52 = arith.constant 0 : index
    %111 = vector.load %arg4[%110, %c0_50, %c0_51, %c0_52] : memref<2x4x8x32xf32, #tpu.memory_space<vmem>>, vector<1x4x8x32xf32>
    %112 = vector.shape_cast %111 : vector<1x4x8x32xf32> to vector<4x8x32xf32>
    "tpu.trace_start"() <{level = 10 : i32, message = "hsd,hkd->hsk"}> : () -> ()
    %cst_53 = arith.constant dense<0.000000e+00> : vector<4x8x8xf32>
    %113 = tpu.matmul %109, %112, %cst_53 {dimension_numbers = #tpu.dot_dimension_numbers<[2], [2], [1], [1], [0, 0, 0, 1, 1, 1], [0], [0]>} : vector<4x8x32xf32>, vector<4x8x32xf32>, vector<4x8x8xf32> -> vector<4x8x8xf32>
    "tpu.trace_stop"() : () -> ()
    %114 = arith.index_cast %c1_i32 : i32 to index
    %c0_54 = arith.constant 0 : index
    %c0_55 = arith.constant 0 : index
    %c0_56 = arith.constant 0 : index
    %115 = vector.load %arg5[%114, %c0_54, %c0_55, %c0_56] : memref<2x4x8x32xf32, #tpu.memory_space<vmem>>, vector<1x4x8x32xf32>
    %116 = vector.shape_cast %115 : vector<1x4x8x32xf32> to vector<4x8x32xf32>
    "tpu.trace_start"() <{level = 10 : i32, message = "hsd,hkd->hsk"}> : () -> ()
    %cst_57 = arith.constant dense<0.000000e+00> : vector<4x8x8xf32>
    %117 = tpu.matmul %109, %116, %cst_57 {dimension_numbers = #tpu.dot_dimension_numbers<[2], [2], [1], [1], [0, 0, 0, 1, 1, 1], [0], [0]>} : vector<4x8x32xf32>, vector<4x8x32xf32>, vector<4x8x8xf32> -> vector<4x8x8xf32>
    "tpu.trace_stop"() : () -> ()
    %118 = arith.index_cast %c1_i32 : i32 to index
    %c0_58 = arith.constant 0 : index
    %c0_59 = arith.constant 0 : index
    %c0_60 = arith.constant 0 : index
    %119 = vector.load %arg6[%118, %c0_58, %c0_59, %c0_60] : memref<2x4x8x32xf32, #tpu.memory_space<vmem>>, vector<1x4x8x32xf32>
    %120 = vector.shape_cast %119 : vector<1x4x8x32xf32> to vector<4x8x32xf32>
    "tpu.trace_start"() <{level = 10 : i32, message = "hsd,hkd->hsk"}> : () -> ()
    %cst_61 = arith.constant dense<0.000000e+00> : vector<4x8x8xf32>
    %121 = tpu.matmul %109, %120, %cst_61 {dimension_numbers = #tpu.dot_dimension_numbers<[2], [2], [1], [1], [0, 0, 0, 1, 1, 1], [0], [0]>} : vector<4x8x32xf32>, vector<4x8x32xf32>, vector<4x8x8xf32> -> vector<4x8x8xf32>
    "tpu.trace_stop"() : () -> ()
    "tpu.trace_start"() <{level = 10 : i32, message = "hsk,htk->hst"}> : () -> ()
    %cst_62 = arith.constant dense<0.000000e+00> : vector<4x8x8xf32>
    %122 = tpu.matmul %113, %117, %cst_62 {dimension_numbers = #tpu.dot_dimension_numbers<[2], [2], [1], [1], [0, 0, 0, 1, 1, 1], [0], [0]>} : vector<4x8x8xf32>, vector<4x8x8xf32>, vector<4x8x8xf32> -> vector<4x8x8xf32>
    "tpu.trace_stop"() : () -> ()
    %123 = arith.addf %122, %0 : vector<4x8x8xf32>
    %cst_63 = arith.constant dense<0xFF800000> : vector<4x8xf32>
    %124 = vector.multi_reduction <maximumf>, %123, %cst_63 [2] : vector<4x8x8xf32> to vector<4x8xf32>
    %125 = vector.shape_cast %124 : vector<4x8xf32> to vector<4x8x1xf32>
    %126 = vector.broadcast %125 : vector<4x8x1xf32> to vector<4x8x8xf32>
    %127 = arith.subf %123, %126 : vector<4x8x8xf32>
    %128 = math.exp %127 : vector<4x8x8xf32>
    %cst_64 = arith.constant dense<0.000000e+00> : vector<4x8xf32>
    %129 = vector.multi_reduction <add>, %128, %cst_64 [2] : vector<4x8x8xf32> to vector<4x8xf32>
    %130 = vector.shape_cast %129 : vector<4x8xf32> to vector<4x8x1xf32>
    %131 = tpu.reciprocal %130 {approx = true} : vector<4x8x1xf32> -> vector<4x8x1xf32>
    %132 = vector.broadcast %131 : vector<4x8x1xf32> to vector<4x8x8xf32>
    %133 = arith.mulf %128, %132 : vector<4x8x8xf32>
    "tpu.trace_start"() <{level = 10 : i32, message = "hst,htk->hsk"}> : () -> ()
    %cst_65 = arith.constant dense<0.000000e+00> : vector<4x8x8xf32>
    %134 = tpu.matmul %133, %121, %cst_65 {dimension_numbers = #tpu.dot_dimension_numbers<[2], [1], [1], [2], [0, 0, 0, 1, 1, 2], [0], [0]>} : vector<4x8x8xf32>, vector<4x8x8xf32>, vector<4x8x8xf32> -> vector<4x8x8xf32>
    "tpu.trace_stop"() : () -> ()
    %135 = arith.index_cast %c1_i32 : i32 to index
    %c0_66 = arith.constant 0 : index
    %c0_67 = arith.constant 0 : index
    %c0_68 = arith.constant 0 : index
    %136 = vector.load %arg7[%135, %c0_66, %c0_67, %c0_68] : memref<2x4x8x32xf32, #tpu.memory_space<vmem>>, vector<1x4x8x32xf32>
    %137 = vector.shape_cast %136 : vector<1x4x8x32xf32> to vector<4x8x32xf32>
    "tpu.trace_start"() <{level = 10 : i32, message = "hsk,hkd->hsd"}> : () -> ()
    %cst_69 = arith.constant dense<0.000000e+00> : vector<4x8x32xf32>
    %138 = tpu.matmul %134, %137, %cst_69 {dimension_numbers = #tpu.dot_dimension_numbers<[2], [1], [1], [2], [0, 0, 0, 1, 1, 2], [0], [0]>} : vector<4x8x8xf32>, vector<4x8x32xf32>, vector<4x8x32xf32> -> vector<4x8x32xf32>
    "tpu.trace_stop"() : () -> ()
    %cst_70 = arith.constant dense<0.000000e+00> : vector<8x32xf32>
    %139 = vector.multi_reduction <add>, %138, %cst_70 [0] : vector<4x8x32xf32> to vector<8x32xf32>
    %140 = arith.addf %91, %139 : vector<8x32xf32>
    %141 = arith.index_cast %c1_i32 : i32 to index
    %c0_71 = arith.constant 0 : index
    %c0_72 = arith.constant 0 : index
    %142 = vector.load %arg8[%141, %c0_71, %c0_72] : memref<2x1x32xf32, #tpu.memory_space<vmem>>, vector<1x1x32xf32>
    %143 = vector.shape_cast %142 : vector<1x1x32xf32> to vector<1x32xf32>
    %144 = arith.mulf %140, %140 : vector<8x32xf32>
    %cst_73 = arith.constant dense<0.000000e+00> : vector<8xf32>
    %145 = vector.multi_reduction <add>, %144, %cst_73 [1] : vector<8x32xf32> to vector<8xf32>
    %146 = vector.shape_cast %145 : vector<8xf32> to vector<8x1xf32>
    %cst_74 = arith.constant 3.200000e+01 : f32
    %147 = vector.broadcast %cst_74 : f32 to vector<8x1xf32>
    %148 = arith.divf %146, %147 : vector<8x1xf32>
    %cst_75 = arith.constant 9.99999997E-7 : f32
    %149 = vector.broadcast %cst_75 : f32 to vector<8x1xf32>
    %150 = arith.addf %148, %149 : vector<8x1xf32>
    %151 = math.rsqrt %150 : vector<8x1xf32>
    %152 = vector.broadcast %151 : vector<8x1xf32> to vector<8x32xf32>
    %153 = arith.mulf %140, %152 : vector<8x32xf32>
    %154 = vector.broadcast %143 : vector<1x32xf32> to vector<8x32xf32>
    %155 = arith.mulf %153, %154 : vector<8x32xf32>
    %156 = arith.index_cast %c1_i32 : i32 to index
    %c0_76 = arith.constant 0 : index
    %c0_77 = arith.constant 0 : index
    %157 = vector.load %arg9[%156, %c0_76, %c0_77] : memref<2x32x128xf32, #tpu.memory_space<vmem>>, vector<1x32x128xf32>
    %158 = vector.shape_cast %157 : vector<1x32x128xf32> to vector<32x128xf32>
    %cst_78 = arith.constant dense<0.000000e+00> : vector<8x128xf32>
    %159 = tpu.matmul %155, %158, %cst_78 {dimension_numbers = #tpu.dot_dimension_numbers<[1], [0], [0], [1], [0, 0, 1, 1], [], []>} : vector<8x32xf32>, vector<32x128xf32>, vector<8x128xf32> -> vector<8x128xf32>
    %160 = vector.extract_strided_slice %159 {offsets = [0, 0], sizes = [8, 64], strides = [1, 1]} : vector<8x128xf32> to vector<8x64xf32>
    %161 = vector.extract_strided_slice %159 {offsets = [0, 64], sizes = [8, 64], strides = [1, 1]} : vector<8x128xf32> to vector<8x64xf32>
    %cst_79 = arith.constant 5.000000e-01 : f32
    %162 = vector.broadcast %cst_79 : f32 to vector<8x64xf32>
    %163 = arith.mulf %162, %160 : vector<8x64xf32>
    %164 = arith.mulf %160, %160 : vector<8x64xf32>
    %165 = arith.mulf %164, %160 : vector<8x64xf32>
    %cst_80 = arith.constant 4.471500e-02 : f32
    %166 = vector.broadcast %cst_80 : f32 to vector<8x64xf32>
    %167 = arith.mulf %166, %165 : vector<8x64xf32>
    %168 = arith.addf %160, %167 : vector<8x64xf32>
    %cst_81 = arith.constant 0.797884583 : f32
    %169 = vector.broadcast %cst_81 : f32 to vector<8x64xf32>
    %170 = arith.mulf %169, %168 : vector<8x64xf32>
    %171 = math.tanh %170 : vector<8x64xf32>
    %cst_82 = arith.constant 1.000000e+00 : f32
    %172 = vector.broadcast %cst_82 : f32 to vector<8x64xf32>
    %173 = arith.addf %172, %171 : vector<8x64xf32>
    %174 = arith.mulf %163, %173 : vector<8x64xf32>
    %175 = arith.mulf %174, %161 : vector<8x64xf32>
    %176 = arith.index_cast %c1_i32 : i32 to index
    %c0_83 = arith.constant 0 : index
    %c0_84 = arith.constant 0 : index
    %177 = vector.load %arg10[%176, %c0_83, %c0_84] : memref<2x64x32xf32, #tpu.memory_space<vmem>>, vector<1x64x32xf32>
    %178 = vector.shape_cast %177 : vector<1x64x32xf32> to vector<64x32xf32>
    %cst_85 = arith.constant dense<0.000000e+00> : vector<8x32xf32>
    %179 = tpu.matmul %175, %178, %cst_85 {dimension_numbers = #tpu.dot_dimension_numbers<[1], [0], [0], [1], [0, 0, 1, 1], [], []>} : vector<8x64xf32>, vector<64x32xf32>, vector<8x32xf32> -> vector<8x32xf32>
    %180 = arith.addf %140, %179 : vector<8x32xf32>
    %c2_i32 = arith.constant 2 : i32
    %c0_86 = arith.constant 0 : index
    %c0_87 = arith.constant 0 : index
    %181 = vector.load %arg11[%c0_86, %c0_87] : memref<1x32xf32, #tpu.memory_space<vmem>>, vector<1x32xf32>
    %182 = arith.mulf %180, %180 : vector<8x32xf32>
    %cst_88 = arith.constant dense<0.000000e+00> : vector<8xf32>
    %183 = vector.multi_reduction <add>, %182, %cst_88 [1] : vector<8x32xf32> to vector<8xf32>
    %184 = vector.shape_cast %183 : vector<8xf32> to vector<8x1xf32>
    %cst_89 = arith.constant 3.200000e+01 : f32
    %185 = vector.broadcast %cst_89 : f32 to vector<8x1xf32>
    %186 = arith.divf %184, %185 : vector<8x1xf32>
    %cst_90 = arith.constant 9.99999997E-7 : f32
    %187 = vector.broadcast %cst_90 : f32 to vector<8x1xf32>
    %188 = arith.addf %186, %187 : vector<8x1xf32>
    %189 = math.rsqrt %188 : vector<8x1xf32>
    %190 = vector.broadcast %189 : vector<8x1xf32> to vector<8x32xf32>
    %191 = arith.mulf %180, %190 : vector<8x32xf32>
    %192 = vector.broadcast %181 : vector<1x32xf32> to vector<8x32xf32>
    %193 = arith.mulf %191, %192 : vector<8x32xf32>
    %c0_91 = arith.constant 0 : index
    %c0_92 = arith.constant 0 : index
    %c0_93 = arith.constant 0 : index
    %194 = vector.load %arg12[%c0_91, %c0_92, %c0_93] : memref<1x8x32xf32, #tpu.memory_space<vmem>>, vector<1x8x32xf32>
    %195 = vector.shape_cast %194 : vector<1x8x32xf32> to vector<8x32xf32>
    %196 = vector.shape_cast %193 : vector<8x32xf32> to vector<1x8x32xf32>
    tpu.vector_store %arg12[%c0_91, %c0_92, %c0_93], %196 {strides = array<i32>} : memref<1x8x32xf32, #tpu.memory_space<vmem>>, vector<1x8x32xf32>,
    return
  }
  func.func @transform_0(%arg0: i32) -> (i32, i32, i32) {
    %c0_i32 = arith.constant 0 : i32
    %c0_i32_0 = arith.constant 0 : i32
    %c0_i32_1 = arith.constant 0 : i32
    return %arg0, %c0_i32, %c0_i32_0 : i32, i32, i32
  }
  func.func @transform_1(%arg0: i32) -> (i32, i32, i32) {
    %c0_i32 = arith.constant 0 : i32
    %c0_i32_0 = arith.constant 0 : i32
    %c0_i32_1 = arith.constant 0 : i32
    %c0_i32_2 = arith.constant 0 : i32
    return %c0_i32, %c0_i32_0, %c0_i32_1 : i32, i32, i32
  }
  func.func @transform_2(%arg0: i32) -> (i32, i32, i32) {
    %c0_i32 = arith.constant 0 : i32
    %c0_i32_0 = arith.constant 0 : i32
    %c0_i32_1 = arith.constant 0 : i32
    %c0_i32_2 = arith.constant 0 : i32
    return %c0_i32, %c0_i32_0, %c0_i32_1 : i32, i32, i32
  }
  func.func @transform_3(%arg0: i32) -> (i32, i32, i32, i32) {
    %c0_i32 = arith.constant 0 : i32
    %c0_i32_0 = arith.constant 0 : i32
    %c0_i32_1 = arith.constant 0 : i32
    %c0_i32_2 = arith.constant 0 : i32
    %c0_i32_3 = arith.constant 0 : i32
    return %c0_i32, %c0_i32_0, %c0_i32_1, %c0_i32_2 : i32, i32, i32, i32
  }
  func.func @transform_4(%arg0: i32) -> (i32, i32, i32, i32) {
    %c0_i32 = arith.constant 0 : i32
    %c0_i32_0 = arith.constant 0 : i32
    %c0_i32_1 = arith.constant 0 : i32
    %c0_i32_2 = arith.constant 0 : i32
    %c0_i32_3 = arith.constant 0 : i32
    return %c0_i32, %c0_i32_0, %c0_i32_1, %c0_i32_2 : i32, i32, i32, i32
  }
  func.func @transform_5(%arg0: i32) -> (i32, i32, i32, i32) {
    %c0_i32 = arith.constant 0 : i32
    %c0_i32_0 = arith.constant 0 : i32
    %c0_i32_1 = arith.constant 0 : i32
    %c0_i32_2 = arith.constant 0 : i32
    %c0_i32_3 = arith.constant 0 : i32
    return %c0_i32, %c0_i32_0, %c0_i32_1, %c0_i32_2 : i32, i32, i32, i32
  }
  func.func @transform_6(%arg0: i32) -> (i32, i32, i32, i32) {
    %c0_i32 = arith.constant 0 : i32
    %c0_i32_0 = arith.constant 0 : i32
    %c0_i32_1 = arith.constant 0 : i32
    %c0_i32_2 = arith.constant 0 : i32
    %c0_i32_3 = arith.constant 0 : i32
    return %c0_i32, %c0_i32_0, %c0_i32_1, %c0_i32_2 : i32, i32, i32, i32
  }
  func.func @transform_7(%arg0: i32) -> (i32, i32, i32) {
    %c0_i32 = arith.constant 0 : i32
    %c0_i32_0 = arith.constant 0 : i32
    %c0_i32_1 = arith.constant 0 : i32
    %c0_i32_2 = arith.constant 0 : i32
    return %c0_i32, %c0_i32_0, %c0_i32_1 : i32, i32, i32
  }
  func.func @transform_8(%arg0: i32) -> (i32, i32, i32) {
    %c0_i32 = arith.constant 0 : i32
    %c0_i32_0 = arith.constant 0 : i32
    %c0_i32_1 = arith.constant 0 : i32
    %c0_i32_2 = arith.constant 0 : i32
    return %c0_i32, %c0_i32_0, %c0_i32_1 : i32, i32, i32
  }
  func.func @transform_9(%arg0: i32) -> (i32, i32, i32) {
    %c0_i32 = arith.constant 0 : i32
    %c0_i32_0 = arith.constant 0 : i32
    %c0_i32_1 = arith.constant 0 : i32
    %c0_i32_2 = arith.constant 0 : i32
    return %c0_i32, %c0_i32_0, %c0_i32_1 : i32, i32, i32
  }
  func.func @transform_10(%arg0: i32) -> (i32, i32) {
    %c0_i32 = arith.constant 0 : i32
    %c0_i32_0 = arith.constant 0 : i32
    %c0_i32_1 = arith.constant 0 : i32
    return %c0_i32, %c0_i32_0 : i32, i32
  }
  func.func @transform_11(%arg0: i32) -> (i32, i32, i32) {
    %c0_i32 = arith.constant 0 : i32
    %c0_i32_0 = arith.constant 0 : i32
    %c0_i32_1 = arith.constant 0 : i32
    return %arg0, %c0_i32, %c0_i32_0 : i32, i32, i32
  }
}

</mosaic_0001>

<bundles_post_ra>
// kernel: t5_encoder_forward.1
= control target key start
LH: loop header
LB: loop body
LE: loop exit
PB: predicated region body
PF: predicated region fallthrough
CT: control target
= control target key end

     0   :  { %s5997_s0 = inlined_call_operand.vmem [shape: f32[2,8,32], index: 0, kind: input, shape index: {}]   ;;  %s5998_s1 = inlined_call_operand.vmem [shape: f32[4,8,8], index: 1, kind: input, shape index: {}]   ;;  %s5999_s2 = inlined_call_operand.vmem [shape: f32[2,1,32], index: 2, kind: input, shape index: {}]   ;;  %s6000_s3 = inlined_call_operand.vmem [shape: f32[2,4,8,32], index: 3, kind: input, shape index: {}]   ;;  %s6001_s4 = inlined_call_operand.vmem [shape: f32[2,4,8,32], index: 4, kind: input, shape index: {}]   ;;  %s6002_s5 = inlined_call_operand.vmem [shape: f32[2,4,8,32], index: 5, kind: input, shape index: {}]   ;;  %s6003_s6 = inlined_call_operand.vmem [shape: f32[2,4,8,32], index: 6, kind: input, shape index: {}]   ;;  %s6004_s7 = inlined_call_operand.vmem [shape: f32[2,1,32], index: 7, kind: input, shape index: {}]   ;;  %s6005_s8 = inlined_call_operand.vmem [shape: f32[2,32,128], index: 8, kind: input, shape index: {}]   ;;  %s6006_s9 = inlined_call_operand.vmem [shape: f32[2,64,32], index: 9, kind: input, shape index: {}]   ;;  %s6007_s10 = inlined_call_operand.vmem [shape: f32[1,32], index: 10, kind: input, shape index: {}]   ;;  %s6008_s11 = inlined_call_operand.hbm [shape: f32[2,8,32], index: 11, kind: output, shape index: {}]  }
   0x1   :  { %6009 = sst [smem:[#allocation5_spill]] %s5997_s0 }
   0x2   :  { %16 = vsyncpa [#allocation3], 0 }
   0x3   :  { %18 = vsyncpa [#allocation3 + $0x1], 0  ;;  %s5376_s17 = smov 0   ;;  %s5378_s18 = smov 0  }
   0x4   :  { %s5380_s19 = smov 0   ;;  %s5382_s20 = smov 0  }
   0x5 LB: > { %s5397_s21 = sadd.s32 4294967295, %s5309_s20   ;;  %s4569_s22 = sadd.s32 4294967294, %s5309_s20   ;;  %s5309_s20 = sphi %s5382_s20, %s6016_s20   ;;  %s5305_s19 = sphi %s5380_s19, %s6015_s19   ;;  %s5301_s18 = sphi %s5378_s18, %s6014_s18   ;;  %s5297_s17 = sphi %s5376_s17, %s6013_s17  }
   0x6   : > { %s5401_s23 = sadd.s32 1, %s5309_s20   ;;  %s267_s24 = sadd.s32 1, %s5305_s19 }
   0x7   : > { %s264_s25 = ssub.s32 %s5309_s20, %s5401_s23  ;;  %p277_p0 = scmp.ne.s32.totalorder %s5305_s19, %s5301_s18 }
   0x8   : > { %p265_p1 = scmp.eq.s32.totalorder %s264_s25, 0  ;;  %p278_p2 = scmp.eq.s32.totalorder %s5397_s21, 1 }
   0x9   : > { %p283_p3 = scmp.ne.s32.totalorder %s5301_s18, %s5297_s17  ;;  %p284_p4 = scmp.eq.s32.totalorder %s4569_s22, 1 }
   0xa   : > { %s5412_s26 = scalar_select %p265_p1, %s5305_s19, %s267_s24  }
   0xb   : > { %p5414_p5 = por %p278_p2, %p277_p0  ;;  %p5418_p6 = por %p284_p4, %p283_p3 }
   0xc   : > { %p4572_p7 = scmp.ge.s32.totalorder %s5309_s20, 1  ;;  %p339_p8 = scmp.lt.s32.totalorder %s5309_s20, 3 }
   0xe   : > { %p340_p9 = pnand %p4572_p7, %p339_p8 }
   0xf   : > { %p378_p10 = scmp.lt.s32.totalorder (!%p340_p9), %s5397_s21, 1  ;;  %s6012_s0 = sld [smem:[#allocation5_spill]] (!%p340_p9)  ;;  %vm389_vm0 = vcmask (!%p340_p9), 261120   ;;  %v5311_v3 = vmov (!%p340_p9), 0.0   ;;  %v405_v4 = vld [vmem:[%s6000_s3] sm:$0xff] (!%p340_p9)  ;;  %v408_v5 = vld [vmem:[%s6000_s3 + $0x18] sm:$0xff] (!%p340_p9) }
  0x10   : > { %343 = sbr.rel (%p340_p9) target bundleno = 4331 (0x10eb), region = 64  ;;  %4822 = vmatprep.subr.mxu0 (!%p340_p9), %v5311_v3  ;;  %4837 = vmatprep.subr.mxu1 (!%p340_p9), %v5311_v3  ;;  %vm5312_vm1 = vmmov (!%p340_p9), 0   ;;  %v4575_v10 = vld [vmem:[%s5999_s2] ss:$0 sm:$0xff] (!%p340_p9)  ;;  %v406_v13 = vld [vmem:[%s6000_s3 + $0x8] sm:$0xff] (!%p340_p9)  ;;  %v407_v15 = vld [vmem:[%s6000_s3 + $0x10] sm:$0xff] (!%p340_p9) }
  0x11   : > { %4823 = vmatpush3.xpose.msk.msra.mxu0 (!%p340_p9), %vm389_vm0, %v405_v4  ;;  %4838 = vmatpush3.xpose.msk.msra.mxu1 (!%p340_p9), %vm389_vm0, %v408_v5  ;;  %v705_v14 = vld [vmem:[%s6001_s4 + $0x8] sm:$0xff] (!%p340_p9)  ;;  %v707_v16 = vld [vmem:[%s6001_s4 + $0x18] sm:$0xff] (!%p340_p9)  ;;  %v704_v17 = vld [vmem:[%s6001_s4] sm:$0xff] (!%p340_p9)  ;;  %vm1296_vm2 = vcmask (!%p340_p9), 64512   ;;  %s5314_s13 = smov (!%p340_p9), 64   ;;  %vm2356_vm3 = vcmask (!%p340_p9), 523264  }
  0x12   : > { %4827 = vmatprep.subr.mxu0 (!%p340_p9), %v5311_v3  ;;  %4847 = vmatprep.subr.mxu1 (!%p340_p9), %v5311_v3  ;;  %v1001_v18 = vld [vmem:[%s6002_s5 + $0x8] sm:$0xff] (!%p340_p9)  ;;  %v706_v19 = vld [vmem:[%s6001_s4 + $0x10] sm:$0xff] (!%p340_p9)  ;;  %v1003_v20 = vld [vmem:[%s6002_s5 + $0x18] sm:$0xff] (!%p340_p9) }
  0x13   : > { %4824 = vmatprep.mubr.msk.f32.mxu0 (!%p340_p9), %vm5312_vm1, %v5311_v3  ;;  %4839 = vmatprep.mubr.msk.f32.mxu1 (!%p340_p9), %vm5312_vm1, %v5311_v3  ;;  %v1000_v21 = vld [vmem:[%s6002_s5] sm:$0xff] (!%p340_p9)  ;;  %v1002_v22 = vld [vmem:[%s6002_s5 + $0x10] sm:$0xff] (!%p340_p9)  ;;  %v5569_v47 = vld [vmem:[%s5998_s1 + $0x8] sm:$0xff] (!%p340_p9) }
  0x14   : > { %v5576_v54 = vld [vmem:[%s5998_s1] sm:$0xff] (!%p340_p9)  ;;  %v5581_v55 = vld [vmem:[%s5998_s1 + $0x18] sm:$0xff] (!%p340_p9)  ;;  %v5587_v59 = vld [vmem:[%s5998_s1 + $0x10] sm:$0xff] (!%p340_p9) }
  0x17   : > { %s379_s29 = scalar_select %p378_p10, %s5397_s21, 1 }
  0x19   : > { %s4574_s30 = sshll.u32 %s379_s29, 3 }
  0x1a   : > { %s381_s14 = scalar_lea.vmem %s6012_s0, %s4574_s30 }
  0x1b   : > { %v5429_v0 = vld [vmem:[%s381_s14] sm:$0xff]  ;;  %s4695_s14 = sshll.u32 %s5397_s21, 7  ;;  %s5315_s21 = smov [#allocation2]  }
  0x1c   : > { %v388_v1 = vmul.f32 %v5429_v0, %v5429_v0  ;;  %s5954_s25 = scalar_lea.hbm %s6008_s11, %s4695_s14 }
  0x1e   : > { %v390_v2 = vsel %vm389_vm0, %v388_v1, 0.0 }
  0x1f   : > { %391 = vadd.xlane.f32.xlu0 %v390_v2 }
  0xac   : > { %v392_v6 = vpop.xlane.xlu0 %391 }
  0xad   : > { %v394_v7 = vmul.f32 0.03125, %v392_v6 }
  0xaf   : > { %v395_v8 = vadd.f32 1e-06, %v394_v7 }
  0xb1   : > { %5201 = vrsqrt.f32 %v395_v8 }
  0xbb   : > { %v5202_v9 = vpop.eup %5201 }
  0xbc   : > { %v397_v11 = vmul.f32 %v5202_v9, %v5429_v0 }
  0xbe   : > { %v404_v12 = vmul.f32 %v4575_v10, %v397_v11 }
  0xc0   : > { %4825 = vmatmul.mubr.msk.f32.vlgmr.msra.gmra.mrb[0].mxu0 %vm389_vm0, %v404_v12  ;;  %4840 = vmatmul.mubr.msk.f32.vlgmr.msra.gmra.mrb[0].mxu1 %vm389_vm0, %v404_v12 }
  0xc1   : > { %4828 = vmatpush3.xpose.msk.msra.mxu0 %vm389_vm0, %v406_v13  ;;  %4848 = vmatpush3.xpose.msk.msra.mxu1 %vm389_vm0, %v705_v14 }
  0xc2   : > { %4829 = vmatprep.mubr.msk.f32.mxu0 %vm5312_vm1, %v5311_v3  ;;  %4849 = vmatprep.mubr.msk.f32.mxu1 %vm5312_vm1, %v5311_v3 }
  0xc3   : > { %4832 = vmatprep.subr.mxu0 %v5311_v3  ;;  %4857 = vmatprep.subr.mxu1 %v5311_v3 }
  0xc4   : > { %4830 = vmatmul.mubr.msk.f32.vlgmr.msra.gmra.mrb[2].mxu0 %vm389_vm0, %v404_v12  ;;  %4850 = vmatmul.mubr.msk.f32.vlgmr.msra.gmra.mrb[2].mxu1 %vm389_vm0, %v404_v12 }
  0xc5   : > { %4833 = vmatpush3.xpose.msk.msra.mxu0 %vm389_vm0, %v407_v15  ;;  %4858 = vmatpush3.xpose.msk.msra.mxu1 %vm389_vm0, %v707_v16 }
  0xc6   : > { %4834 = vmatprep.mubr.msk.f32.mxu0 %vm5312_vm1, %v5311_v3  ;;  %4859 = vmatprep.mubr.msk.f32.mxu1 %vm5312_vm1, %v5311_v3 }
  0xc7   : > { %4842 = vmatprep.subr.mxu0 %v5311_v3  ;;  %4867 = vmatprep.subr.mxu1 %v5311_v3 }
  0xc8   : > { %4835 = vmatmul.mubr.msk.f32.vlgmr.msra.gmra.mrb[4].mxu0 %vm389_vm0, %v404_v12  ;;  %4860 = vmatmul.mubr.msk.f32.vlgmr.msra.gmra.mrb[4].mxu1 %vm389_vm0, %v404_v12 }
  0xc9   : > { %4843 = vmatpush3.xpose.msk.msra.mxu0 %vm389_vm0, %v704_v17  ;;  %4868 = vmatpush3.xpose.msk.msra.mxu1 %vm389_vm0, %v1001_v18 }
  0xca   : > { %4844 = vmatprep.mubr.msk.f32.mxu0 %vm5312_vm1, %v5311_v3  ;;  %4869 = vmatprep.mubr.msk.f32.mxu1 %vm5312_vm1, %v5311_v3 }
  0xcb   : > { %4852 = vmatprep.subr.mxu0 %v5311_v3  ;;  %4877 = vmatprep.subr.mxu1 %v5311_v3 }
  0xcc   : > { %4845 = vmatmul.mubr.msk.f32.vlgmr.msra.gmra.mrb[6].mxu0 %vm389_vm0, %v404_v12  ;;  %4870 = vmatmul.mubr.msk.f32.vlgmr.msra.gmra.mrb[6].mxu1 %vm389_vm0, %v404_v12 }
  0xcd   : > { %4853 = vmatpush3.xpose.msk.msra.mxu0 %vm389_vm0, %v706_v19  ;;  %4878 = vmatpush3.xpose.msk.msra.mxu1 %vm389_vm0, %v1003_v20 }
  0xce   : > { %4854 = vmatprep.mubr.msk.f32.mxu0 %vm5312_vm1, %v5311_v3  ;;  %4879 = vmatprep.mubr.msk.f32.mxu1 %vm5312_vm1, %v5311_v3 }
  0xcf   : > { %4862 = vmatprep.subr.mxu0 %v5311_v3  ;;  %4887 = vmatprep.subr.mxu1 %v5311_v3 }
  0xd0   : > { %4855 = vmatmul.mubr.msk.f32.vlgmr.msra.gmra.mrb[8].mxu0 %vm389_vm0, %v404_v12  ;;  %4880 = vmatmul.mubr.msk.f32.vlgmr.msra.gmra.mrb[8].mxu1 %vm389_vm0, %v404_v12 }
  0xd1   : > { %4863 = vmatpush3.xpose.msk.msra.mxu0 %vm389_vm0, %v1000_v21  ;;  %4864 = vmatprep.mubr.msk.f32.mxu0 %vm5312_vm1, %v5311_v3 }
  0xd2   : > { %4872 = vmatprep.subr.mxu0 %v5311_v3  ;;  %4889 = vmatprep.mubr.msk.f32.mxu1 %vm5312_vm1, %v5311_v3 }
  0xd4   : > { %4865 = vmatmul.mubr.msk.f32.vlgmr.msra.gmra.mrb[10].mxu0 %vm389_vm0, %v404_v12 }
  0xd5   : > { %4873 = vmatpush3.xpose.msk.msra.mxu0 %vm389_vm0, %v1002_v22  ;;  %4874 = vmatprep.mubr.msk.f32.mxu0 %vm5312_vm1, %v5311_v3 }
  0xd6   : > { %4882 = vmatprep.subr.mxu0 %v5311_v3 }
  0xd8   : > { %4875 = vmatmul.mubr.msk.f32.vlgmr.msra.gmra.mrb[12].mxu0 %vm389_vm0, %v404_v12 }
  0xd9   : > { %4884 = vmatprep.mubr.msk.f32.mxu0 %vm5312_vm1, %v5311_v3 }
 0x193   : > { %v481_v23 = vpop.f32.mrb[0].mxu0  ;;  %v700_v24 = vpop.f32.mrb[0].mxu1 }
 0x194   : > { %v4826_v25 = vpop.f32.mrb[1].mxu0  ;;  %v4841_v26 = vpop.f32.mrb[1].mxu1 }
 0x197   : > { %v554_v27 = vpop.f32.mrb[2].mxu0  ;;  %v850_v28 = vpop.f32.mrb[2].mxu1 }
 0x198   : > { %v4831_v29 = vpop.f32.mrb[3].mxu0  ;;  %v4851_v30 = vpop.f32.mrb[3].mxu1  ;;  %4888 = vmatpush3.xpose.msk.msra.mxu1 %vm1296_vm2, %v850_v28 }
 0x199   : > { %4897 = vmatprep.subr.mxu1 %v5311_v3 }
 0x19b   : > { %v627_v31 = vpop.f32.mrb[4].mxu0  ;;  %v996_v32 = vpop.f32.mrb[4].mxu1  ;;  %4890 = vmatmul.mubr.msk.f32.vlgmr.msra.gmra.mrb[10].mxu1 %vm1296_vm2, %v554_v27 }
 0x19c   : > { %v4836_v33 = vpop.f32.mrb[5].mxu0  ;;  %v4861_v34 = vpop.f32.mrb[5].mxu1  ;;  %4898 = vmatpush3.xpose.msk.msra.mxu1 %vm1296_vm2, %v996_v32  ;;  %4899 = vmatprep.mubr.msk.f32.mxu1 %vm5312_vm1, %v5311_v3 }
 0x19d   : > { %4907 = vmatprep.subr.mxu1 %v5311_v3 }
 0x19f   : > { %v777_v35 = vpop.f32.mrb[6].mxu0  ;;  %v1146_v36 = vpop.f32.mrb[6].mxu1  ;;  %4900 = vmatmul.mubr.msk.f32.vlgmr.msra.gmra.mrb[12].mxu1 %vm1296_vm2, %v700_v24 }
 0x1a0   : > { %v4846_v37 = vpop.f32.mrb[7].mxu0  ;;  %v4871_v38 = vpop.f32.mrb[7].mxu1  ;;  %4883 = vmatpush3.xpose.msk.msra.mxu0 %vm1296_vm2, %v777_v35  ;;  %4908 = vmatpush3.msra.mxu1 %v1146_v36 }
 0x1a1   : > { %4892 = vmatprep.subr.mxu0 %v5311_v3  ;;  %4909 = vmatprep.mubr.msk.f32.mxu1 %vm5312_vm1, %v5311_v3  ;;  %v1938_v37 = vld [vmem:[%s6003_s6 + $0x8] sm:$0xff]  ;;  %v1937_v38 = vld [vmem:[%s6003_s6] sm:$0xff] }
 0x1a2   : > { %4917 = vmatprep.subr.mxu1 %v5311_v3 }
 0x1a3   : > { %v923_v39 = vpop.f32.mrb[8].mxu0  ;;  %v5553_v40 = vpop.f32.mrb[8].mxu1  ;;  %4885 = vmatmul.mubr.msk.f32.vlgmr.msra.gmra.mrb[14].mxu0 %vm1296_vm2, %v481_v23 }
 0x1a4   : > { %v4856_v41 = vpop.f32.mrb[9].mxu0  ;;  %v4881_v42 = vpop.f32.mrb[9].mxu1  ;;  %4893 = vmatpush3.xpose.msk.msra.mxu0 %vm1296_vm2, %v923_v39  ;;  %4894 = vmatprep.mubr.msk.f32.mxu0 %vm5312_vm1, %v5311_v3  ;;  %v1940_v39 = vld [vmem:[%s6003_s6 + $0x18] sm:$0xff] }
 0x1a5   : > { %4902 = vmatprep.subr.mxu0 %v5311_v3  ;;  %v1939_v42 = vld [vmem:[%s6003_s6 + $0x10] sm:$0xff] }
 0x1a7   : > { %v1073_v43 = vpop.f32.mrb[10].mxu0  ;;  %4895 = vmatmul.mubr.msk.f32.vlgmr.msra.gmra.mrb[16].mxu0 %vm1296_vm2, %v627_v31 }
 0x1a8   : > { %v4866_v44 = vpop.f32.mrb[11].mxu0  ;;  %4903 = vmatpush3.msra.mxu0 %v1073_v43  ;;  %4904 = vmatprep.mubr.msk.f32.mxu0 %vm5312_vm1, %v5311_v3 }
 0x1a9   : > { %4912 = vmatprep.subr.mxu0 %v5311_v3 }
 0x1ab   : > { %v5564_v45 = vpop.f32.mrb[12].mxu0 }
 0x1ac   : > { %v4876_v46 = vpop.f32.mrb[13].mxu0 }
 0x26e   : > { %v1445_v48 = vpop.f32.mrb[10].mxu1 }
 0x26f   : > { %v1446_v49 = vadd.f32 %v1445_v48, %v5569_v47  ;;  %v4891_v50 = vpop.f32.mrb[11].mxu1 }
 0x271   : > { %v1604_v51 = vsel %vm1296_vm2, %v1446_v49, -inf }
 0x272   : > { %1605 = vmax.xlane.f32.xlu1 %v1604_v51  ;;  %v1597_v52 = vpop.f32.mrb[12].mxu1 }
 0x273   : > { %v4901_v53 = vpop.f32.mrb[13].mxu1  ;;  %v1598_v60 = vadd.f32 %v1597_v52, %v5581_v55 }
 0x275   : > { %v1610_v2 = vsel %vm1296_vm2, %v1598_v60, -inf }
 0x276   : > { %v1369_v56 = vpop.f32.mrb[14].mxu0 }
 0x277   : > { %v1370_v57 = vadd.f32 %v1369_v56, %v5576_v54  ;;  %v4886_v58 = vpop.f32.mrb[15].mxu0 }
 0x279   : > { %v1601_v61 = vsel %vm1296_vm2, %v1370_v57, -inf }
 0x27a   : > { %1602 = vmax.xlane.f32.xlu0 %v1601_v61  ;;  %v1521_v62 = vpop.f32.mrb[16].mxu0 }
 0x27b   : > { %v1522_v63 = vadd.f32 %v1521_v62, %v5587_v59  ;;  %v4896_v1 = vpop.f32.mrb[17].mxu0 }
 0x27d   : > { %v1607_v4 = vsel %vm1296_vm2, %v1522_v63, -inf }
 0x27e   : > { %1611 = vmax.xlane.f32.xlu0 %v1610_v2  ;;  %1608 = vmax.xlane.f32.xlu1 %v1607_v4 }
 0x2ff   : > { %v1606_v5 = vpop.xlane.xlu1 %1605 }
 0x300   : > { %v1614_v6 = vsub.f32 %v1446_v49, %v1606_v5 }
 0x302   : > { %v1619_v7 = vmul.f32 1.442695, %v1614_v6 }
 0x304   : > { %5203 = vpow2.f32 %v1619_v7 }
 0x307   : > { %v1603_v8 = vpop.xlane.xlu0 %1602 }
 0x308   : > { %v1613_v9 = vsub.f32 %v1370_v57, %v1603_v8 }
 0x30a   : > { %v1617_v10 = vmul.f32 1.442695, %v1613_v9  ;;  %v2257_v9 = vld [vmem:[%s6005_s8] sm:$0xff] }
 0x30b   : > { %v1612_v11 = vpop.xlane.xlu0 %1611  ;;  %v1609_v12 = vpop.xlane.xlu1 %1608 }
 0x30c   : > { %5205 = vpow2.f32 %v1617_v10  ;;  %v1616_v13 = vsub.f32 %v1598_v60, %v1612_v11  ;;  %v1615_v14 = vsub.f32 %v1522_v63, %v1609_v12  ;;  %v2258_v10 = vld [vmem:[%s6005_s8 + $0x8] sm:$0xff]  ;;  %v5313_v12 = vmov 0.0|0.0  }
 0x30d   : > { %v5123_v11 = vpack.c.bf16 %v2258_v10, %v2257_v9  ;;  %v4635_v9 = vld [vmem:[%s6001_s4 + $0x30] sm:$0xff]  ;;  %v4648_v10 = vld [vmem:[%s6002_s5 + $0x38] sm:$0xff] }
 0x30e   : > { %v5204_v15 = vpop.eup %5203  ;;  %v1623_v16 = vmul.f32 1.442695, %v1616_v13  ;;  %v1621_v17 = vmul.f32 1.442695, %v1615_v14  ;;  %v2260_v13 = vld [vmem:[%s6005_s8 + $0x18] sm:$0xff] }
 0x30f   : > { %v1628_v18 = vsel %vm1296_vm2, %v5204_v15, 0.0 }
 0x310   : > { %5207 = vpow2.f32 %v1623_v16  ;;  %1629 = vadd.xlane.f32.xlu0 %v1628_v18 }
 0x311   : > { %5209 = vpow2.f32 %v1621_v17 }
 0x316   : > { %v5206_v19 = vpop.eup %5205 }
 0x317   : > { %v1625_v20 = vsel %vm1296_vm2, %v5206_v19, 0.0 }
 0x318   : > { %1626 = vadd.xlane.f32.xlu1 %v1625_v20 }
 0x31a   : > { %v5208_v21 = vpop.eup %5207 }
 0x31b   : > { %v5210_v22 = vpop.eup %5209  ;;  %v1634_v23 = vsel %vm1296_vm2, %v5208_v21, 0.0 }
 0x31c   : > { %1635 = vadd.xlane.f32.xlu0 %v1634_v23  ;;  %v1631_v24 = vsel %vm1296_vm2, %v5210_v22, 0.0  ;;  %v2349_v23 = vld [vmem:[%s6006_s9 + $0x8] sm:$0xff] }
 0x31d   : > { %1632 = vadd.xlane.f32.xlu1 %v1631_v24  ;;  %v2350_v24 = vld [vmem:[%s6006_s9 + $0x10] sm:$0xff] }
 0x39d   : > { %v1630_v25 = vpop.xlane.xlu0 %1629 }
 0x39e   : > { %5211 = vrcp.f32 %v1630_v25 }
 0x3a5   : > { %v1627_v26 = vpop.xlane.xlu1 %1626 }
 0x3a6   : > { %5213 = vrcp.f32 %v1627_v26  ;;  %v2351_v26 = vld [vmem:[%s6006_s9 + $0x18] sm:$0xff] }
 0x3a8   : > { %v5212_v27 = vpop.eup %5211 }
 0x3a9   : > { %v1642_v28 = vmul.f32 %v5212_v27, %v5204_v15  ;;  %v1636_v29 = vpop.xlane.xlu0 %1635  ;;  %v5132_v27 = vpack.c.bf16 %v2351_v26, %v2350_v24 }
 0x3aa   : > { %5215 = vrcp.f32 %v1636_v29  ;;  %v1633_v30 = vpop.xlane.xlu1 %1632  ;;  %v2353_v29 = vld [vmem:[%s6006_s9 + $0x28] sm:$0xff] }
 0x3ab   : > { %5217 = vrcp.f32 %v1633_v30  ;;  %4910 = vmatmul.mubr.msk.f32.vlgmr.msra.gmra.mrb[14].mxu1 %vm1296_vm2, %v1642_v28  ;;  %v2352_v28 = vld [vmem:[%s6006_s9 + $0x20] sm:$0xff] }
 0x3ac   : > { %4918 = vmatpush3.msra.mxu1 %v5553_v40  ;;  %4919 = vmatprep.mubr.msk.f32.mxu1 %vm5312_vm1, %v5311_v3  ;;  %v5135_v30 = vpack.c.bf16 %v2353_v29, %v2352_v28 }
 0x3ad   : > { %4927 = vmatprep.subr.mxu1 %v5311_v3 }
 0x3b0   : > { %v5214_v31 = vpop.eup %5213 }
 0x3b1   : > { %v1641_v32 = vmul.f32 %v5214_v31, %v5206_v19  ;;  %v4616_v19 = vld [vmem:[%s6004_s7] ss:$0 sm:$0xff]  ;;  %v2354_v31 = vld [vmem:[%s6006_s9 + $0x30] sm:$0xff] }
 0x3b3   : > { %4905 = vmatmul.mubr.msk.f32.vlgmr.msra.gmra.mrb[18].mxu0 %vm1296_vm2, %v1641_v32  ;;  %v2355_v32 = vld [vmem:[%s6006_s9 + $0x38] sm:$0xff] }
 0x3b4   : > { %v5216_v33 = vpop.eup %5215  ;;  %4913 = vmatpush3.msra.mxu0 %v5564_v45  ;;  %4914 = vmatprep.mubr.msk.f32.mxu0 %vm5312_vm1, %v5311_v3 }
 0x3b5   : > { %v5218_v34 = vpop.eup %5217  ;;  %v1644_v35 = vmul.f32 %v5216_v33, %v5208_v21  ;;  %4922 = vmatprep.subr.mxu0 %v5311_v3  ;;  %v5138_v33 = vpack.c.bf16 %v2355_v32, %v2354_v31 }
 0x3b6   : > { %v1643_v36 = vmul.f32 %v5218_v34, %v5210_v22  ;;  %v2348_v22 = vld [vmem:[%s6006_s9] sm:$0xff] }
 0x3b7   : > { %4920 = vmatmul.mubr.msk.f32.vlgmr.msra.gmra.mrb[16].mxu1 %vm1296_vm2, %v1644_v35  ;;  %v5129_v25 = vpack.c.bf16 %v2349_v23, %v2348_v22 }
 0x3b8   : > { %4915 = vmatmul.mubr.msk.f32.vlgmr.msra.gmra.mrb[20].mxu0 %vm1296_vm2, %v1643_v36  ;;  %4929 = vmatprep.mubr.msk.f32.mxu1 %vm5312_vm1, %v5311_v3 }
 0x3b9   : > { %4924 = vmatprep.mubr.msk.f32.mxu0 %vm5312_vm1, %v5311_v3  ;;  %4928 = vmatpush3.msra.mxu1 %v1938_v37 }
 0x3ba   : > { %4923 = vmatpush3.msra.mxu0 %v1937_v38  ;;  %4937 = vmatprep.subr.mxu1 %v5311_v3 }
 0x3bb   : > { %4932 = vmatprep.subr.mxu0 %v5311_v3 }
 0x47e   : > { %v1787_v40 = vpop.f32.mrb[14].mxu1 }
 0x47f   : > { %v4911_v41 = vpop.f32.mrb[15].mxu1  ;;  %4930 = vmatmul.mubr.msk.f32.vlgmr.msra.gmra.mrb[18].mxu1 %vm1296_vm2, %v1787_v40 }
 0x480   : > { %4938 = vmatpush3.msra.mxu1 %v1940_v39  ;;  %4939 = vmatprep.mubr.msk.f32.mxu1 %vm5312_vm1, %v5311_v3 }
 0x481   : > { %5128 = vmatprep.subr.bf16.mxu1 %v5313_v12 }
 0x486   : > { %v1714_v43 = vpop.f32.mrb[18].mxu0 }
 0x487   : > { %v4906_v44 = vpop.f32.mrb[19].mxu0  ;;  %4925 = vmatmul.mubr.msk.f32.vlgmr.msra.gmra.mrb[22].mxu0 %vm1296_vm2, %v1714_v43 }
 0x488   : > { %4933 = vmatpush3.msra.mxu0 %v1939_v42  ;;  %4934 = vmatprep.mubr.msk.f32.mxu0 %vm5312_vm1, %v5311_v3 }
 0x489   : > { %5122 = vmatprep.subr.bf16.mxu0 %v5313_v12 }
 0x48a   : > { %v1933_v45 = vpop.f32.mrb[16].mxu1 }
 0x48b   : > { %v1860_v46 = vpop.f32.mrb[20].mxu0  ;;  %v4921_v48 = vpop.f32.mrb[17].mxu1  ;;  %4940 = vmatmul.mubr.msk.f32.vlgmr.msra.gmra.mrb[20].mxu1 %vm1296_vm2, %v1933_v45 }
 0x48c   : > { %v4916_v49 = vpop.f32.mrb[21].mxu0  ;;  %4935 = vmatmul.mubr.msk.f32.vlgmr.msra.gmra.mrb[24].mxu0 %vm1296_vm2, %v1860_v46  ;;  %4969 = vmatprep.mubr.msk.f32.mxu1 %vm5312_vm1, %v5311_v3 }
 0x48d   : > { %4950 = vmatprep.mubr.msk.f32.mxu0 %vm5312_vm1, %v5311_v3  ;;  %5124 = vmatpush3.bf16.msra.mxu0 %v5123_v11  ;;  %v4645_v11 = vld [vmem:[%s6002_s5 + $0x20] sm:$0xff] }
 0x48e   : > { %5125 = vmatprep.subr.bf16.mxu0 %v5313_v12  ;;  %5130 = vmatpush3.bf16.msra.mxu1 %v5129_v25 }
 0x48f   : > { %5131 = vmatprep.subr.bf16.mxu1 %v5313_v12 }
 0x492   : > { %5133 = vmatpush3.bf16.msra.mxu1 %v5132_v27 }
 0x493   : > { %5134 = vmatprep.subr.bf16.mxu1 %v5313_v12 }
 0x496   : > { %5136 = vmatpush3.bf16.msra.mxu1 %v5135_v30 }
 0x497   : > { %5137 = vmatprep.subr.bf16.mxu1 %v5313_v12 }
 0x49a   : > { %5139 = vmatpush3.bf16.msra.mxu1 %v5138_v33 }
 0x49b   : > { %4987 = vmatprep.subr.mxu1 %v5311_v3 }
 0x552   : > { %v2083_v50 = vpop.f32.mrb[18].mxu1 }
 0x553   : > { %v4931_v51 = vpop.f32.mrb[19].mxu1  ;;  %v2234_v53 = vsel %vm389_vm0, %v2083_v50, 0.0 }
 0x55a   : > { %v2010_v52 = vpop.f32.mrb[22].mxu0 }
 0x55b   : > { %v2233_v56 = vsel %vm389_vm0, %v2010_v52, 0.0  ;;  %v4926_v57 = vpop.f32.mrb[23].mxu0 }
 0x55c   : > { %v2235_v58 = vadd.f32 %v2234_v53, %v2233_v56  ;;  %v4621_v53 = vld [vmem:[%s6000_s3 + $0x20] sm:$0xff]  ;;  %v4624_v56 = vld [vmem:[%s6000_s3 + $0x38] sm:$0xff] }
 0x55e   : > { %v2229_v60 = vpop.f32.mrb[20].mxu1 }
 0x55f   : > { %v2156_v61 = vpop.f32.mrb[24].mxu0  ;;  %v4941_v62 = vpop.f32.mrb[21].mxu1  ;;  %v2238_v4 = vsel %vm389_vm0, %v2229_v60, 0.0 }
 0x560   : > { %v2236_v63 = vsel %vm389_vm0, %v2156_v61, 0.0  ;;  %v4936_v1 = vpop.f32.mrb[25].mxu0  ;;  %v4620_v62 = vld [vmem:[%s5999_s2 + $0x1] ss:$0 sm:$0xff] }
 0x561   : > { %v2237_v2 = vadd.f32 %v2236_v63, %v2235_v58 }
 0x563   : > { %v2239_v5 = vadd.f32 %v2238_v4, %v2237_v2  ;;  %v4622_v2 = vld [vmem:[%s6000_s3 + $0x28] sm:$0xff] }
 0x564   : > { %v4634_v4 = vld [vmem:[%s6001_s4 + $0x28] sm:$0xff] }
 0x565   : > { %v5645_v6 = vadd.f32 %v2239_v5, %v5429_v0  ;;  %v2259_v0 = vld [vmem:[%s6005_s8 + $0x10] sm:$0xff] }
 0x566   : > { %v5126_v14 = vpack.c.bf16 %v2260_v13, %v2259_v0  ;;  %v4623_v5 = vld [vmem:[%s6000_s3 + $0x30] sm:$0xff] }
 0x567   : > { %v2242_v7 = vmul.f32 %v5645_v6, %v5645_v6  ;;  %v4647_v0 = vld [vmem:[%s6002_s5 + $0x30] sm:$0xff] }
 0x568   : > { %5127 = vmatpush3.bf16.msra.mxu0 %v5126_v14 }
 0x569   : > { %v2243_v8 = vsel %vm389_vm0, %v2242_v7, 0.0  ;;  %4972 = vmatprep.subr.mxu0 %v5311_v3  ;;  %v4633_v7 = vld [vmem:[%s6001_s4 + $0x20] sm:$0xff] }
 0x56a   : > { %2244 = vadd.xlane.f32.xlu1 %v2243_v8  ;;  %v4646_v8 = vld [vmem:[%s6002_s5 + $0x28] sm:$0xff] }
 0x5f7   : > { %v2245_v15 = vpop.xlane.xlu1 %2244 }
 0x5f8   : > { %v2246_v16 = vmul.f32 0.03125, %v2245_v15 }
 0x5fa   : > { %v2247_v17 = vadd.f32 1e-06, %v2246_v16 }
 0x5fc   : > { %5219 = vrsqrt.f32 %v2247_v17 }
 0x606   : > { %v5220_v18 = vpop.eup %5219 }
 0x607   : > { %v2249_v20 = vmul.f32 %v5220_v18, %v5645_v6 }
 0x609   : > { %v2256_v21 = vmul.f32 %v4616_v19, %v2249_v20 }
 0x60b   : > { %4951 = vmatmul.mubr.msk.f32.vlgmr.msra.gmra.mrb[26].mxu0 %vm389_vm0, %v2256_v21 }
 0x60c   : > { %4974 = vmatprep.mubr.msk.f32.mxu0 %vm5312_vm1, %v5311_v3  ;;  %4973 = vmatpush3.xpose.msk.msra.mxu0 %vm389_vm0, %v4621_v53 }
 0x60d   : > { %4977 = vmatprep.subr.mxu0 %v5311_v3 }
 0x6de   : > { %v2330_v34 = vpop.f32.mrb[26].mxu0 }
 0x6df   : > { %2344 = vrot.lane.b32.xlu0 %v2330_v34, %s5314_s13  ;;  %v4952_v35 = vpop.f32.mrb[27].mxu0  ;;  %v2335_v36 = vmul.f32 %v2330_v34, %v2330_v34  ;;  %v2334_v43 = vmul.f32 0.5, %v2330_v34 }
 0x6e1   : > { %v2336_v37 = vmul.f32 %v2335_v36, %v2330_v34 }
 0x6e3   : > { %v2337_v38 = vmul.f32 0.044715, %v2336_v37 }
 0x6e5   : > { %v2338_v39 = vadd.f32 %v2337_v38, %v2330_v34 }
 0x6e7   : > { %v2339_v40 = vmul.f32 0.7978846, %v2338_v39 }
 0x6e9   : > { %5221 = vtanh.f32 %v2339_v40 }
 0x6f3   : > { %v5222_v41 = vpop.eup %5221 }
 0x6f4   : > { %v2341_v42 = vadd.f32 1.0, %v5222_v41 }
 0x6f6   : > { %v2342_v44 = vmul.f32 %v2341_v42, %v2334_v43 }
 0x751   : > { %v2345_v45 = vpop.permute.xlu0 %2344 }
 0x752   : > { %v2347_v46 = vmul.f32 %v2345_v45, %v2342_v44 }
 0x754   : > { %4970 = vmatmul.mubr.msk.f32.vlgmr.msra.gmra.mrb[22].mxu1 %vm2356_vm3, %v2347_v46 }
 0x755   : > { %4989 = vmatprep.mubr.msk.f32.mxu1 %vm5312_vm1, %v5311_v3  ;;  %4988 = vmatpush3.xpose.msk.msra.mxu1 %vm389_vm0, %v4624_v56 }
 0x756   : > { %4997 = vmatprep.subr.mxu1 %v5311_v3 }
 0x827   : > { %v2426_v48 = vpop.f32.mrb[22].mxu1 }
 0x828   : > { %v5706_v49 = vadd.f32 %v2426_v48, %v5645_v6  ;;  %v4971_v50 = vpop.f32.mrb[23].mxu1  ;;  %v4636_v6 = vld [vmem:[%s6001_s4 + $0x38] sm:$0xff] }
 0x82a   : > { %v2433_v51 = vmul.f32 %v5706_v49, %v5706_v49 }
 0x82c   : > { %v2434_v52 = vsel %vm389_vm0, %v2433_v51, 0.0 }
 0x82d   : > { %2435 = vadd.xlane.f32.xlu1 %v2434_v52 }
 0x8ba   : > { %v2436_v57 = vpop.xlane.xlu1 %2435 }
 0x8bb   : > { %v2437_v58 = vmul.f32 0.03125, %v2436_v57 }
 0x8bd   : > { %v2438_v60 = vadd.f32 1e-06, %v2437_v58 }
 0x8bf   : > { %5223 = vrsqrt.f32 %v2438_v60 }
 0x8c9   : > { %v5224_v61 = vpop.eup %5223 }
 0x8ca   : > { %v2440_v63 = vmul.f32 %v5224_v61, %v5706_v49 }
 0x8cc   : > { %v2447_v1 = vmul.f32 %v4620_v62, %v2440_v63 }
 0x8ce   : > { %4975 = vmatmul.mubr.msk.f32.vlgmr.msra.gmra.mrb[28].mxu0 %vm389_vm0, %v2447_v1  ;;  %4990 = vmatmul.mubr.msk.f32.vlgmr.msra.gmra.mrb[24].mxu1 %vm389_vm0, %v2447_v1 }
 0x8cf   : > { %4978 = vmatpush3.xpose.msk.msra.mxu0 %vm389_vm0, %v4622_v2  ;;  %4998 = vmatpush3.xpose.msk.msra.mxu1 %vm389_vm0, %v4634_v4 }
 0x8d0   : > { %4979 = vmatprep.mubr.msk.f32.mxu0 %vm5312_vm1, %v5311_v3  ;;  %4999 = vmatprep.mubr.msk.f32.mxu1 %vm5312_vm1, %v5311_v3 }
 0x8d1   : > { %4982 = vmatprep.subr.mxu0 %v5311_v3  ;;  %5007 = vmatprep.subr.mxu1 %v5311_v3 }
 0x8d2   : > { %4980 = vmatmul.mubr.msk.f32.vlgmr.msra.gmra.mrb[30].mxu0 %vm389_vm0, %v2447_v1  ;;  %5000 = vmatmul.mubr.msk.f32.vlgmr.msra.gmra.mrb[26].mxu1 %vm389_vm0, %v2447_v1 }
 0x8d3   : > { %4983 = vmatpush3.xpose.msk.msra.mxu0 %vm389_vm0, %v4623_v5  ;;  %5008 = vmatpush3.xpose.msk.msra.mxu1 %vm389_vm0, %v4636_v6 }
 0x8d4   : > { %4984 = vmatprep.mubr.msk.f32.mxu0 %vm5312_vm1, %v5311_v3  ;;  %5009 = vmatprep.mubr.msk.f32.mxu1 %vm5312_vm1, %v5311_v3 }
 0x8d5   : > { %4992 = vmatprep.subr.mxu0 %v5311_v3  ;;  %5017 = vmatprep.subr.mxu1 %v5311_v3 }
 0x8d6   : > { %4985 = vmatmul.mubr.msk.f32.vlgmr.msra.gmra.mrb[32].mxu0 %vm389_vm0, %v2447_v1  ;;  %5010 = vmatmul.mubr.msk.f32.vlgmr.msra.gmra.mrb[28].mxu1 %vm389_vm0, %v2447_v1 }
 0x8d7   : > { %4993 = vmatpush3.xpose.msk.msra.mxu0 %vm389_vm0, %v4633_v7  ;;  %5018 = vmatpush3.xpose.msk.msra.mxu1 %vm389_vm0, %v4646_v8 }
 0x8d8   : > { %4994 = vmatprep.mubr.msk.f32.mxu0 %vm5312_vm1, %v5311_v3  ;;  %5019 = vmatprep.mubr.msk.f32.mxu1 %vm5312_vm1, %v5311_v3 }
 0x8d9   : > { %5002 = vmatprep.subr.mxu0 %v5311_v3  ;;  %5027 = vmatprep.subr.mxu1 %v5311_v3 }
 0x8da   : > { %4995 = vmatmul.mubr.msk.f32.vlgmr.msra.gmra.mrb[34].mxu0 %vm389_vm0, %v2447_v1  ;;  %5020 = vmatmul.mubr.msk.f32.vlgmr.msra.gmra.mrb[30].mxu1 %vm389_vm0, %v2447_v1 }
 0x8db   : > { %5003 = vmatpush3.xpose.msk.msra.mxu0 %vm389_vm0, %v4635_v9  ;;  %5028 = vmatpush3.xpose.msk.msra.mxu1 %vm389_vm0, %v4648_v10 }
 0x8dc   : > { %5004 = vmatprep.mubr.msk.f32.mxu0 %vm5312_vm1, %v5311_v3  ;;  %5029 = vmatprep.mubr.msk.f32.mxu1 %vm5312_vm1, %v5311_v3 }
 0x8dd   : > { %5012 = vmatprep.subr.mxu0 %v5311_v3  ;;  %5037 = vmatprep.subr.mxu1 %v5311_v3 }
 0x8de   : > { %5005 = vmatmul.mubr.msk.f32.vlgmr.msra.gmra.mrb[36].mxu0 %vm389_vm0, %v2447_v1  ;;  %5030 = vmatmul.mubr.msk.f32.vlgmr.msra.gmra.mrb[32].mxu1 %vm389_vm0, %v2447_v1 }
 0x8df   : > { %5013 = vmatpush3.xpose.msk.msra.mxu0 %vm389_vm0, %v4645_v11  ;;  %5014 = vmatprep.mubr.msk.f32.mxu0 %vm5312_vm1, %v5311_v3 }
 0x8e0   : > { %5022 = vmatprep.subr.mxu0 %v5311_v3  ;;  %5039 = vmatprep.mubr.msk.f32.mxu1 %vm5312_vm1, %v5311_v3 }
 0x8e2   : > { %5015 = vmatmul.mubr.msk.f32.vlgmr.msra.gmra.mrb[38].mxu0 %vm389_vm0, %v2447_v1 }
 0x8e3   : > { %5023 = vmatpush3.xpose.msk.msra.mxu0 %vm389_vm0, %v4647_v0  ;;  %5024 = vmatprep.mubr.msk.f32.mxu0 %vm5312_vm1, %v5311_v3 }
 0x8e4   : > { %5032 = vmatprep.subr.mxu0 %v5311_v3 }
 0x8e6   : > { %5025 = vmatmul.mubr.msk.f32.vlgmr.msra.gmra.mrb[40].mxu0 %vm389_vm0, %v2447_v1 }
 0x8e7   : > { %5034 = vmatprep.mubr.msk.f32.mxu0 %vm5312_vm1, %v5311_v3 }
 0x9a1   : > { %v2525_v13 = vpop.f32.mrb[28].mxu0  ;;  %v2744_v14 = vpop.f32.mrb[24].mxu1 }
 0x9a2   : > { %v4976_v15 = vpop.f32.mrb[29].mxu0  ;;  %v4991_v16 = vpop.f32.mrb[25].mxu1 }
 0x9a5   : > { %v2598_v17 = vpop.f32.mrb[30].mxu0  ;;  %v2895_v18 = vpop.f32.mrb[26].mxu1 }
 0x9a6   : > { %v4981_v19 = vpop.f32.mrb[31].mxu0  ;;  %v5001_v20 = vpop.f32.mrb[27].mxu1  ;;  %5038 = vmatpush3.xpose.msk.msra.mxu1 %vm1296_vm2, %v2895_v18 }
 0x9a7   : > { %5047 = vmatprep.subr.mxu1 %v5311_v3 }
 0x9a9   : > { %v2671_v21 = vpop.f32.mrb[32].mxu0  ;;  %v3041_v22 = vpop.f32.mrb[28].mxu1  ;;  %5040 = vmatmul.mubr.msk.f32.vlgmr.msra.gmra.mrb[34].mxu1 %vm1296_vm2, %v2598_v17 }
 0x9aa   : > { %v4986_v23 = vpop.f32.mrb[33].mxu0  ;;  %v5011_v24 = vpop.f32.mrb[29].mxu1  ;;  %5048 = vmatpush3.xpose.msk.msra.mxu1 %vm1296_vm2, %v3041_v22  ;;  %5049 = vmatprep.mubr.msk.f32.mxu1 %vm5312_vm1, %v5311_v3 }
 0x9ab   : > { %5057 = vmatprep.subr.mxu1 %v5311_v3  ;;  %v4670_v24 = vld [vmem:[%s6003_s6 + $0x28] sm:$0xff] }
 0x9ad   : > { %v2822_v25 = vpop.f32.mrb[34].mxu0  ;;  %v3192_v26 = vpop.f32.mrb[30].mxu1  ;;  %5050 = vmatmul.mubr.msk.f32.vlgmr.msra.gmra.mrb[36].mxu1 %vm1296_vm2, %v2744_v14 }
 0x9ae   : > { %v4996_v27 = vpop.f32.mrb[35].mxu0  ;;  %v5021_v28 = vpop.f32.mrb[31].mxu1  ;;  %5033 = vmatpush3.xpose.msk.msra.mxu0 %vm1296_vm2, %v2822_v25  ;;  %5058 = vmatpush3.msra.mxu1 %v3192_v26  ;;  %v4669_v25 = vld [vmem:[%s6003_s6 + $0x20] sm:$0xff]  ;;  %v4672_v26 = vld [vmem:[%s6003_s6 + $0x38] sm:$0xff] }
 0x9af   : > { %5042 = vmatprep.subr.mxu0 %v5311_v3  ;;  %5059 = vmatprep.mubr.msk.f32.mxu1 %vm5312_vm1, %v5311_v3 }
 0x9b0   : > { %5067 = vmatprep.subr.mxu1 %v5311_v3 }
 0x9b1   : > { %v2968_v29 = vpop.f32.mrb[36].mxu0  ;;  %v5824_v30 = vpop.f32.mrb[32].mxu1  ;;  %5035 = vmatmul.mubr.msk.f32.vlgmr.msra.gmra.mrb[42].mxu0 %vm1296_vm2, %v2525_v13 }
 0x9b2   : > { %v5006_v31 = vpop.f32.mrb[37].mxu0  ;;  %v5031_v32 = vpop.f32.mrb[33].mxu1  ;;  %5043 = vmatpush3.xpose.msk.msra.mxu0 %vm1296_vm2, %v2968_v29  ;;  %5044 = vmatprep.mubr.msk.f32.mxu0 %vm5312_vm1, %v5311_v3  ;;  %v4671_v29 = vld [vmem:[%s6003_s6 + $0x30] sm:$0xff] }
 0x9b3   : > { %5052 = vmatprep.subr.mxu0 %v5311_v3 }
 0x9b5   : > { %v3119_v33 = vpop.f32.mrb[38].mxu0  ;;  %5045 = vmatmul.mubr.msk.f32.vlgmr.msra.gmra.mrb[44].mxu0 %vm1296_vm2, %v2671_v21 }
 0x9b6   : > { %v5016_v34 = vpop.f32.mrb[39].mxu0  ;;  %5053 = vmatpush3.msra.mxu0 %v3119_v33  ;;  %5054 = vmatprep.mubr.msk.f32.mxu0 %vm5312_vm1, %v5311_v3 }
 0x9b7   : > { %5062 = vmatprep.subr.mxu0 %v5311_v3 }
 0x9b9   : > { %v5835_v35 = vpop.f32.mrb[40].mxu0 }
 0x9ba   : > { %v5026_v36 = vpop.f32.mrb[41].mxu0 }
 0xa7c   : > { %v3490_v37 = vpop.f32.mrb[34].mxu1 }
 0xa7d   : > { %v3491_v38 = vadd.f32 %v3490_v37, %v5569_v47  ;;  %v5041_v39 = vpop.f32.mrb[35].mxu1 }
 0xa7f   : > { %v3649_v40 = vsel %vm1296_vm2, %v3491_v38, -inf }
 0xa80   : > { %3650 = vmax.xlane.f32.xlu1 %v3649_v40  ;;  %v3642_v41 = vpop.f32.mrb[36].mxu1 }
 0xa81   : > { %v5051_v42 = vpop.f32.mrb[37].mxu1  ;;  %v3643_v52 = vadd.f32 %v3642_v41, %v5581_v55 }
 0xa83   : > { %v3655_v53 = vsel %vm1296_vm2, %v3643_v52, -inf }
 0xa84   : > { %v3414_v43 = vpop.f32.mrb[42].mxu0 }
 0xa85   : > { %v3415_v44 = vadd.f32 %v3414_v43, %v5576_v54  ;;  %v5036_v45 = vpop.f32.mrb[43].mxu0 }
 0xa87   : > { %v3646_v46 = vsel %vm1296_vm2, %v3415_v44, -inf }
 0xa88   : > { %3647 = vmax.xlane.f32.xlu1 %v3646_v46  ;;  %v3566_v48 = vpop.f32.mrb[44].mxu0 }
 0xa89   : > { %v3567_v50 = vadd.f32 %v3566_v48, %v5587_v59  ;;  %v5046_v51 = vpop.f32.mrb[45].mxu0 }
 0xa8b   : > { %v3652_v47 = vsel %vm1296_vm2, %v3567_v50, -inf }
 0xa8c   : > { %3653 = vmax.xlane.f32.xlu1 %v3652_v47 }
 0xa90   : > { %3656 = vmax.xlane.f32.xlu1 %v3655_v53 }
 0xb0d   : > { %v3651_v56 = vpop.xlane.xlu1 %3650 }
 0xb0e   : > { %v3659_v57 = vsub.f32 %v3491_v38, %v3651_v56  ;;  %v4679_v56 = vld [vmem:[%s6005_s8 + $0x20] sm:$0xff] }
 0xb10   : > { %v3664_v58 = vmul.f32 1.442695, %v3659_v57  ;;  %v4680_v57 = vld [vmem:[%s6005_s8 + $0x28] sm:$0xff] }
 0xb12   : > { %5225 = vpow2.f32 %v3664_v58  ;;  %v5141_v58 = vpack.c.bf16 %v4680_v57, %v4679_v56 }
 0xb15   : > { %v3648_v54 = vpop.xlane.xlu1 %3647 }
 0xb16   : > { %v3658_v60 = vsub.f32 %v3415_v44, %v3648_v54  ;;  %v4682_v54 = vld [vmem:[%s6005_s8 + $0x38] sm:$0xff] }
 0xb18   : > { %v3662_v61 = vmul.f32 1.442695, %v3658_v60 }
 0xb19   : > { %v3654_v62 = vpop.xlane.xlu1 %3653 }
 0xb1a   : > { %5227 = vpow2.f32 %v3662_v61  ;;  %v3660_v63 = vsub.f32 %v3567_v50, %v3654_v62 }
 0xb1c   : > { %v5226_v59 = vpop.eup %5225  ;;  %v3666_v1 = vmul.f32 1.442695, %v3660_v63 }
 0xb1d   : > { %v3657_v2 = vpop.xlane.xlu1 %3656  ;;  %v3673_v55 = vsel %vm1296_vm2, %v5226_v59, 0.0 }
 0xb1e   : > { %5229 = vpow2.f32 %v3666_v1  ;;  %v3661_v4 = vsub.f32 %v3643_v52, %v3657_v2  ;;  %3674 = vadd.xlane.f32.xlu0 %v3673_v55  ;;  %v4678_v1 = vld [vmem:[%s6004_s7 + $0x1] ss:$0 sm:$0xff] }
 0xb20   : > { %v3668_v5 = vmul.f32 1.442695, %v3661_v4  ;;  %v4684_v4 = vld [vmem:[%s6006_s9 + $0x40] sm:$0xff] }
 0xb22   : > { %5231 = vpow2.f32 %v3668_v5  ;;  %v4685_v5 = vld [vmem:[%s6006_s9 + $0x48] sm:$0xff] }
 0xb24   : > { %v5228_v6 = vpop.eup %5227 }
 0xb25   : > { %v3670_v7 = vsel %vm1296_vm2, %v5228_v6, 0.0 }
 0xb26   : > { %3671 = vadd.xlane.f32.xlu1 %v3670_v7  ;;  %v5147_v7 = vpack.c.bf16 %v4685_v5, %v4684_v4 }
 0xb28   : > { %v5230_v8 = vpop.eup %5229 }
 0xb29   : > { %v3676_v9 = vsel %vm1296_vm2, %v5230_v8, 0.0 }
 0xb2a   : > { %3677 = vadd.xlane.f32.xlu1 %v3676_v9 }
 0xb2c   : > { %v5232_v10 = vpop.eup %5231 }
 0xb2d   : > { %v3679_v11 = vsel %vm1296_vm2, %v5232_v10, 0.0 }
 0xb2e   : > { %3680 = vadd.xlane.f32.xlu1 %v3679_v11  ;;  %v4689_v11 = vld [vmem:[%s6006_s9 + $0x68] sm:$0xff] }
 0xbab   : > { %v3675_v0 = vpop.xlane.xlu0 %3674 }
 0xbac   : > { %5233 = vrcp.f32 %v3675_v0 }
 0xbb3   : > { %v3672_v13 = vpop.xlane.xlu1 %3671 }
 0xbb4   : > { %5235 = vrcp.f32 %v3672_v13  ;;  %v4690_v13 = vld [vmem:[%s6006_s9 + $0x70] sm:$0xff] }
 0xbb6   : > { %v5234_v14 = vpop.eup %5233 }
 0xbb7   : > { %v3687_v15 = vmul.f32 %v5234_v14, %v5226_v59  ;;  %v3678_v16 = vpop.xlane.xlu1 %3677  ;;  %v4691_v14 = vld [vmem:[%s6006_s9 + $0x78] sm:$0xff] }
 0xbb8   : > { %5237 = vrcp.f32 %v3678_v16 }
 0xbb9   : > { %5060 = vmatmul.mubr.msk.f32.vlgmr.msra.gmra.mrb[38].mxu1 %vm1296_vm2, %v3687_v15  ;;  %v5156_v15 = vpack.c.bf16 %v4691_v14, %v4690_v13 }
 0xbba   : > { %5068 = vmatpush3.msra.mxu1 %v5824_v30  ;;  %5069 = vmatprep.mubr.msk.f32.mxu1 %vm5312_vm1, %v5311_v3 }
 0xbbb   : > { %v3681_v17 = vpop.xlane.xlu1 %3680  ;;  %5077 = vmatprep.subr.mxu1 %v5311_v3 }
 0xbbc   : > { %5239 = vrcp.f32 %v3681_v17 }
 0xbbe   : > { %v5236_v18 = vpop.eup %5235 }
 0xbbf   : > { %v3686_v19 = vmul.f32 %v5236_v18, %v5228_v6  ;;  %v4686_v6 = vld [vmem:[%s6006_s9 + $0x50] sm:$0xff] }
 0xbc1   : > { %5055 = vmatmul.mubr.msk.f32.vlgmr.msra.gmra.mrb[46].mxu0 %vm1296_vm2, %v3686_v19 }
 0xbc2   : > { %v5238_v20 = vpop.eup %5237  ;;  %5063 = vmatpush3.msra.mxu0 %v5835_v35  ;;  %5064 = vmatprep.mubr.msk.f32.mxu0 %vm5312_vm1, %v5311_v3 }
 0xbc3   : > { %v3688_v21 = vmul.f32 %v5238_v20, %v5230_v8  ;;  %5072 = vmatprep.subr.mxu0 %v5311_v3  ;;  %v4687_v8 = vld [vmem:[%s6006_s9 + $0x58] sm:$0xff] }
 0xbc4   : > { %v5150_v9 = vpack.c.bf16 %v4687_v8, %v4686_v6 }
 0xbc5   : > { %5065 = vmatmul.mubr.msk.f32.vlgmr.msra.gmra.mrb[48].mxu0 %vm1296_vm2, %v3688_v21 }
 0xbc6   : > { %v5240_v22 = vpop.eup %5239  ;;  %5074 = vmatprep.mubr.msk.f32.mxu0 %vm5312_vm1, %v5311_v3  ;;  %5073 = vmatpush3.msra.mxu0 %v4669_v25 }
 0xbc7   : > { %v3689_v23 = vmul.f32 %v5240_v22, %v5232_v10  ;;  %5082 = vmatprep.subr.mxu0 %v5311_v3  ;;  %v4688_v10 = vld [vmem:[%s6006_s9 + $0x60] sm:$0xff] }
 0xbc8   : > { %v5153_v0 = vpack.c.bf16 %v4689_v11, %v4688_v10 }
 0xbc9   : > { %5070 = vmatmul.mubr.msk.f32.vlgmr.msra.gmra.mrb[40].mxu1 %vm1296_vm2, %v3689_v23 }
 0xbca   : > { %5079 = vmatprep.mubr.msk.f32.mxu1 %vm5312_vm1, %v5311_v3  ;;  %5078 = vmatpush3.msra.mxu1 %v4670_v24 }
 0xbcb   : > { %5087 = vmatprep.subr.mxu1 %v5311_v3 }
 0xc8c   : > { %v3832_v27 = vpop.f32.mrb[38].mxu1 }
 0xc8d   : > { %v5061_v28 = vpop.f32.mrb[39].mxu1  ;;  %5080 = vmatmul.mubr.msk.f32.vlgmr.msra.gmra.mrb[42].mxu1 %vm1296_vm2, %v3832_v27 }
 0xc8e   : > { %5088 = vmatpush3.msra.mxu1 %v4672_v26  ;;  %5089 = vmatprep.mubr.msk.f32.mxu1 %vm5312_vm1, %v5311_v3 }
 0xc8f   : > { %5146 = vmatprep.subr.bf16.mxu1 %v5313_v12 }
 0xc94   : > { %v3759_v30 = vpop.f32.mrb[46].mxu0 }
 0xc95   : > { %v5056_v31 = vpop.f32.mrb[47].mxu0  ;;  %5075 = vmatmul.mubr.msk.f32.vlgmr.msra.gmra.mrb[50].mxu0 %vm1296_vm2, %v3759_v30 }
 0xc96   : > { %5083 = vmatpush3.msra.mxu0 %v4671_v29  ;;  %5084 = vmatprep.mubr.msk.f32.mxu0 %vm5312_vm1, %v5311_v3 }
 0xc97   : > { %5140 = vmatprep.subr.bf16.mxu0 %v5313_v12 }
 0xc98   : > { %v3905_v32 = vpop.f32.mrb[48].mxu0 }
 0xc99   : > { %v5066_v33 = vpop.f32.mrb[49].mxu0  ;;  %5085 = vmatmul.mubr.msk.f32.vlgmr.msra.gmra.mrb[52].mxu0 %vm1296_vm2, %v3905_v32 }
 0xc9a   : > { %5100 = vmatprep.mubr.msk.f32.mxu0 %vm5312_vm1, %v5311_v3  ;;  %5142 = vmatpush3.bf16.msra.mxu0 %v5141_v58 }
 0xc9b   : > { %5143 = vmatprep.subr.bf16.mxu0 %v5313_v12 }
 0xc9c   : > { %v3978_v34 = vpop.f32.mrb[40].mxu1 }
 0xc9d   : > { %v5071_v35 = vpop.f32.mrb[41].mxu1  ;;  %5090 = vmatmul.mubr.msk.f32.vlgmr.msra.gmra.mrb[44].mxu1 %vm1296_vm2, %v3978_v34 }
 0xc9e   : > { %5119 = vmatprep.mubr.msk.f32.mxu1 %vm5312_vm1, %v5311_v3  ;;  %5148 = vmatpush3.bf16.msra.mxu1 %v5147_v7 }
 0xc9f   : > { %5149 = vmatprep.subr.bf16.mxu1 %v5313_v12 }
 0xca2   : > { %5151 = vmatpush3.bf16.msra.mxu1 %v5150_v9 }
 0xca3   : > { %5152 = vmatprep.subr.bf16.mxu1 %v5313_v12 }
 0xca6   : > { %5154 = vmatpush3.bf16.msra.mxu1 %v5153_v0 }
 0xca7   : > { %5155 = vmatprep.subr.bf16.mxu1 %v5313_v12 }
 0xcaa   : > { %5157 = vmatpush3.bf16.msra.mxu1 %v5156_v15 }
 0xd60   : > { %v4129_v36 = vpop.f32.mrb[42].mxu1 }
 0xd61   : > { %v5081_v37 = vpop.f32.mrb[43].mxu1  ;;  %v4280_v39 = vsel %vm389_vm0, %v4129_v36, 0.0 }
 0xd62   : > { %v4693_v37 = vld [vmem:[%s6007_s10] ss:$0 sm:$0xff] }
 0xd68   : > { %v4056_v38 = vpop.f32.mrb[50].mxu0 }
 0xd69   : > { %v4279_v40 = vsel %vm389_vm0, %v4056_v38, 0.0  ;;  %v5076_v41 = vpop.f32.mrb[51].mxu0 }
 0xd6a   : > { %v4281_v42 = vadd.f32 %v4280_v39, %v4279_v40 }
 0xd6c   : > { %v4202_v43 = vpop.f32.mrb[52].mxu0 }
 0xd6d   : > { %v4282_v44 = vsel %vm389_vm0, %v4202_v43, 0.0  ;;  %v5086_v45 = vpop.f32.mrb[53].mxu0 }
 0xd6e   : > { %v4283_v46 = vadd.f32 %v4282_v44, %v4281_v42 }
 0xd70   : > { %v4275_v48 = vpop.f32.mrb[44].mxu1 }
 0xd71   : > { %v4284_v50 = vsel %vm389_vm0, %v4275_v48, 0.0  ;;  %v5091_v51 = vpop.f32.mrb[45].mxu1 }
 0xd72   : > { %v4285_v52 = vadd.f32 %v4284_v50, %v4283_v46 }
 0xd74   : > { %v4286_v3 = vadd.f32 %v4285_v52, %v5706_v49  ;;  %v4681_v49 = vld [vmem:[%s6005_s8 + $0x30] sm:$0xff] }
 0xd75   : > { %v5144_v60 = vpack.c.bf16 %v4682_v54, %v4681_v49 }
 0xd76   : > { %v4289_v47 = vmul.f32 %v4286_v3, %v4286_v3 }
 0xd77   : > { %5145 = vmatpush3.bf16.msra.mxu0 %v5144_v60 }
 0xd78   : > { %v4290_v53 = vsel %vm389_vm0, %v4289_v47, 0.0 }
 0xd79   : > { %4291 = vadd.xlane.f32.xlu1 %v4290_v53 }
 0xe06   : > { %v4292_v61 = vpop.xlane.xlu1 %4291 }
 0xe07   : > { %v4293_v62 = vmul.f32 0.03125, %v4292_v61 }
 0xe09   : > { %v4294_v63 = vadd.f32 1e-06, %v4293_v62 }
 0xe0b   : > { %5241 = vrsqrt.f32 %v4294_v63 }
 0xe15   : > { %v5242_v59 = vpop.eup %5241 }
 0xe16   : > { %v4296_v2 = vmul.f32 %v5242_v59, %v4286_v3 }
 0xe18   : > { %v4303_v55 = vmul.f32 %v4678_v1, %v4296_v2 }
 0xe1a   : > { %5101 = vmatmul.mubr.msk.f32.vlgmr.msra.gmra.mrb[54].mxu0 %vm389_vm0, %v4303_v55 }
 0xeed   : > { %v4378_v16 = vpop.f32.mrb[54].mxu0 }
 0xeee   : > { %4392 = vrot.lane.b32.xlu1 %v4378_v16, %s5314_s13  ;;  %v5102_v17 = vpop.f32.mrb[55].mxu0  ;;  %v4383_v18 = vmul.f32 %v4378_v16, %v4378_v16  ;;  %v4382_v25 = vmul.f32 0.5, %v4378_v16  ;;  %s375_s13 = sand.u32 1, %s5301_s18  }
 0xeef   : > { %s4573_s29 = sshll.u32 %s375_s13, 3  ;;  %s4497_s0 = scalar_lea.sflag [#allocation3], %s375_s13 }
 0xef0   : > { %v4384_v19 = vmul.f32 %v4383_v18, %v4378_v16  ;;  %s377_s15 = scalar_lea.vmem [#allocation2], %s4573_s29  ;;  %s5251_s29 = sshll.u32 %s5315_s21, 4  ;;  %s5252_s29 = int_to_ptr.vmem [resolvable:$false] %s5251_s29 }
 0xef1   : > { %s4510_s16 = sshll.u32 %s377_s15, 4  ;;  %s5253_s12 = scalar_lea.vmem %s5252_s29, 256  ;;  %s5956_s16 = int_to_ptr.vmem [resolvable:$true] %s4510_s16 }
 0xef2   : > { %v4385_v20 = vmul.f32 0.044715, %v4384_v19  ;;  %s5247_s30 = scalar_lea.vmem %s5956_s16, 128  ;;  %p5254_p0 = scmp.lt.s32.totalorder %s5956_s16, %s5252_s29 }
 0xef3   : > { %p5248_p11 = scmp.ne.s32.totalorder %s5956_s16, %s5247_s30  ;;  %p5255_p1 = scmp.lt.s32.totalorder %s5253_s12, %s5247_s30 }
 0xef4   : > { %v4386_v21 = vadd.f32 %v4385_v20, %v4378_v16 }
 0xef5   : > { %p5249_p12 = pnand %p5248_p11, %p5414_p5  ;;  %p5256_p2 = por %p5255_p1, %p5254_p0 }
 0xef6   : > { %v4387_v22 = vmul.f32 0.7978846, %v4386_v21 }
 0xef7   : > { %p5250_p13 = pneg %p5249_p12 }
 0xef8   : > { %5243 = vtanh.f32 %v4387_v22 }
 0xef9   : > { %p5257_p3 = pnand %p5256_p2, %p5250_p13 }
 0xf02   : > { %v5244_v23 = vpop.eup %5243 }
 0xf03   : > { %v4389_v24 = vadd.f32 1.0, %v5244_v23 }
 0xf05   : > { %v4390_v26 = vmul.f32 %v4389_v24, %v4382_v25 }
 0xf60   : > { %v4393_v27 = vpop.permute.xlu1 %4392 }
 0xf61   : > { %v4395_v28 = vmul.f32 %v4393_v27, %v4390_v26 }
 0xf63   : > { %5120 = vmatmul.mubr.msk.f32.vlgmr.msra.gmra.mrb[46].mxu1 %vm2356_vm3, %v4395_v28 }
0x1036   : > { %v4474_v12 = vpop.f32.mrb[46].mxu1 }
0x1037   : > { %v4478_v29 = vadd.f32 %v4474_v12, %v4286_v3  ;;  %v5121_v30 = vpop.f32.mrb[47].mxu1 }
0x1039   : > { %v4480_v31 = vmul.f32 %v4478_v29, %v4478_v29 }
0x103b   : > { %v4481_v32 = vsel %vm389_vm0, %v4480_v31, 0.0 }
0x103c   : > { %4482 = vadd.xlane.f32.xlu0 %v4481_v32 }
0x10c9   : > { %v4483_v33 = vpop.xlane.xlu0 %4482 }
0x10ca   : > { %v4484_v34 = vmul.f32 0.03125, %v4483_v33 }
0x10cc   : > { %v4485_v35 = vadd.f32 1e-06, %v4484_v34 }
0x10ce   : > { %5245 = vrsqrt.f32 %v4485_v35 }
0x10d8   : > { %v5246_v36 = vpop.eup %5245 }
0x10d9   : > { %v4487_v38 = vmul.f32 %v5246_v36, %v4478_v29 }
0x10db   : > { %v4494_v39 = vmul.f32 %v4693_v37, %v4487_v38 }
0x10dd   : > { %4495 = vst.msk [vmem:[%s377_s15] sm:$0xff] %vm389_vm0, %v4494_v39 }
0x10de   : > { %5260 = shalt.err (!%p5257_p3)
}
0x10df   : > { %s5261_s13 = scalar_lea.hbm %s5954_s25, 128  ;;  %s5265_s22 = scalar_lea.hbm %s6008_s11, 256 }
0x10e0   : > { %p5262_p4 = scmp.ne.s32.totalorder %s5954_s25, %s5261_s13  ;;  %p5266_p9 = scmp.lt.u32.totalorder %s5954_s25, %s6008_s11 }
0x10e1   : > { %p5267_p10 = scmp.lt.u32.totalorder %s5265_s22, %s5261_s13  ;;  %p5269_p12 = scmp.lt.u32.totalorder %s5261_s13, %s5954_s25 }
0x10e2   : > { %p5263_p7 = pnand %p5262_p4, %p5414_p5 }
0x10e3   : > { %p5268_p11 = por %p5267_p10, %p5266_p9 }
0x10e4   : > { %p5264_p8 = pneg %p5263_p7 }
0x10e5   : > { %p5270_p13 = por %p5269_p12, %p5268_p11 }
0x10e7   : > { %p5271_p0 = pnand %p5270_p13, %p5264_p8 }
0x10e9   : > { %5274 = shalt.err (!%p5271_p0)
}
0x10ea   : > { %5158 = dma.vmem_to_hbm [thread:$0]  (%p5414_p5), %s5956_s16, 128, %s5954_s25, %s4497_s0  }
0x10eb PF: > { %p5164_p1 = scmp.ge.s32.totalorder %s5309_s20, 2  ;;  %s4522_s30 = sand.u32 1, %s5297_s17  }
0x10ec   : > { %s4523_s29 = scalar_lea.sflag [#allocation3], %s4522_s30 }
0x10ed   : > { %p5161_p2 = pnand %p5164_p1, %p5418_p6 }
0x10ef   : > { %5292 = dma.done.wait (!%p5161_p2), %s4523_s29, 128  }
0x10f0   : > { %5294 = vsyncadd (!%p5161_p2), %s4523_s29, 4294967168  ;;  %p21_p3 = scmp.ge.s32.totalorder %s5401_s23, 4   ;;  %s6013_s17 = smov %s5301_s18 }
0x10f1   : > { %s6014_s18 = smov %s5305_s19  ;;  %s6015_s19 = smov %s5412_s26 }
0x10f2   : > { %s6016_s20 = smov %s5401_s23  ;;  %23 = sbr.rel (!%p21_p3) target bundleno = 5 (0x5), region = 107 }
0x10f9   :  { %4528 = vsyncpa [#allocation3], 1 }
0x10fa   :  { %4530 = vsyncpa [#allocation3 + $0x1], 1 }

</bundles_post_ra>
